<compile_context>
chip_gen: v5e
topology: v5e:2x2
jax: 0.10.0
libtpu: 0.0.40
codegen_flags: <defaults>
</compile_context>

<pallas_src>
import jax
import jax.numpy as jnp
import numpy as np
from jax.experimental import pallas as pl
from jax.experimental.pallas import tpu as pltpu

# ---------------- config (synthetic, deterministic) ----------------
N_DIMS = 4                      # encoding_config['n_dims']
N_FREQS = 4                     # frequency encoding n_frequencies
ENC_HALF = N_DIMS * N_FREQS     # 16  (sin half == cos half)
ENC_DIM = 2 * ENC_HALF          # 32
N_NEURONS = 32                  # network_config n_neurons
N_OUT = 8                       # n_output_dims

# Batch tile on the lane axis. Sweep 2048-8192; on v7x keep the grid length
# >= 2 so both TensorCores get work through the "parallel" grid axis.
TM_DEFAULT = 4096

# frequency scales (float32), repeated per input dim -> column vector (16, 1)
_FREQS_F32 = ((2.0 ** np.arange(N_FREQS)) * np.pi).astype(np.float32)
_FREQ_COL = np.repeat(_FREQS_F32, N_DIMS).reshape(ENC_HALF, 1)


def neupat_kernel(x_ref, freq_ref, w1s_ref, w1c_ref, b1_ref,
                  w2_ref, b2_ref, w3_ref, b3_ref, o_ref):
    # x_ref: (N_DIMS, TM) f32 -- batch on lanes (lane-dense everywhere below).
    x = x_ref[...]

    # ---- Frequency encoding: one dense scale, one sin, one cos ----
    x_rep = jnp.concatenate([x] * N_FREQS, axis=0)      # (16, TM): rows (j, d)
    scaled = x_rep * freq_ref[...]                      # row k = 2^(k//D)*pi*x_d
    s = jnp.sin(scaled)                                 # (16, TM)
    c = jnp.cos(scaled)                                 # (16, TM)

    # ---- MLP (MXU), hidden width 32, batch on lanes ----
    h = (jnp.dot(w1s_ref[...], s, preferred_element_type=jnp.float32)
         + jnp.dot(w1c_ref[...], c, preferred_element_type=jnp.float32)
         + b1_ref[...])                                 # (32, TM)
    h = jnp.maximum(h, 0.0)
    h = jnp.dot(w2_ref[...], h, preferred_element_type=jnp.float32) + b2_ref[...]
    h = jnp.maximum(h, 0.0)
    y = jnp.dot(w3_ref[...], h, preferred_element_type=jnp.float32) + b3_ref[...]

    # ---- .to(float32).abs() ---- (lane-dense unmasked stores: last dim = TM)
    o_ref[...] = jnp.abs(y).astype(jnp.float32)


def neupat_forward(x, params, *, tm=TM_DEFAULT):
    """x: [N, N_DIMS] float32 (any N).  Returns [N, N_OUT] float32."""
    assert tm % 128 == 0
    w1s, w1c, b1, w2, b2, w3, b3 = params
    N = x.shape[0]

    # Effective tile: multiple of 128, no larger than needed for small N.
    tm_eff = min(tm, ((N + 127) // 128) * 128)
    n_tiles = pl.cdiv(N, tm_eff)
    padded_n = n_tiles * tm_eff

    # Transpose to batch-on-lanes and zero-pad the tail (layout plumbing only).
    xt = jnp.zeros((N_DIMS, padded_n), jnp.float32)
    xt = xt.at[:, :N].set(x.T.astype(jnp.float32))
    freq = jnp.asarray(_FREQ_COL)

    def full(arr):  # whole array resident in VMEM, same block every step
        return pl.BlockSpec(arr.shape, lambda i: (0,) * arr.ndim)

    out_t = pl.pallas_call(
        neupat_kernel,
        out_shape=jax.ShapeDtypeStruct((N_OUT, padded_n), jnp.float32),
        grid_spec=pltpu.PrefetchScalarGridSpec(
            num_scalar_prefetch=0,
            grid=(n_tiles,),
            in_specs=[
                pl.BlockSpec((N_DIMS, tm_eff), lambda i: (0, i)),   # x tile
                full(freq),
                full(w1s), full(w1c), full(b1),
                full(w2), full(b2),
                full(w3), full(b3),
            ],
            out_specs=pl.BlockSpec((N_OUT, tm_eff), lambda i: (0, i)),
        ),
        compiler_params=pltpu.CompilerParams(
            dimension_semantics=("parallel",)),
    )(xt, freq, w1s, w1c, b1, w2, b2, w3, b3)

    return out_t[:, :N].T                               # back to [N, N_OUT]


def init_params(key):
    """Deterministic synthetic weights, stored pre-transposed (out, in)."""
    ks = jax.random.split(key, 6)

    def lin_t(kw, kb, fan_in, fan_out):
        bound = 1.0 / np.sqrt(fan_in)
        wt = jax.random.uniform(kw, (fan_out, fan_in), jnp.float32, -bound, bound)
        b = jax.random.uniform(kb, (fan_out, 1), jnp.float32, -bound, bound)
        return wt, b

    w1t, b1 = lin_t(ks[0], ks[1], ENC_DIM, N_NEURONS)    # (32, 32), (32, 1)
    w1s = w1t[:, :ENC_HALF]                              # (32, 16) sin half
    w1c = w1t[:, ENC_HALF:]                              # (32, 16) cos half
    w2t, b2 = lin_t(ks[2], ks[3], N_NEURONS, N_NEURONS)  # (32, 32), (32, 1)
    w3t, b3 = lin_t(ks[4], ks[5], N_NEURONS, N_OUT)      # (8, 32),  (8, 1)
    return (w1s, w1c, b1, w2t, b2, w3t, b3)


def neupat_reference(x, params):
    """Pure-JAX reference (batch-major) for correctness check."""
    w1s, w1c, b1, w2, b2, w3, b3 = params
    # enc columns ordered (freq-major, dim-minor) to match the kernel layout.
    scaled = jnp.concatenate([x * f for f in _FREQS_F32], axis=-1)   # (N, 16)
    s, c = jnp.sin(scaled), jnp.cos(scaled)
    h = jnp.maximum(s @ w1s.T + c @ w1c.T + b1.T, 0.0)
    h = jnp.maximum(h @ w2.T + b2.T, 0.0)
    y = h @ w3.T + b3.T
    return jnp.abs(y).astype(jnp.float32)


if __name__ == "__main__":
    key = jax.random.PRNGKey(0)
    k_x, k_p = jax.random.split(key)

    N = 300                                   # small; not a multiple of 128 to
    x = jax.random.uniform(k_x, (N, N_DIMS), jnp.float32)  # exercise padding
    params = init_params(k_p)

    out = jax.block_until_ready(neupat_forward(x, params))
    ref = neupat_reference(x, params)

    assert out.shape == (N, N_OUT) and out.dtype == jnp.float32
    np.testing.assert_allclose(np.asarray(out), np.asarray(ref),
                               rtol=1e-5, atol=1e-5)
    print("KERNEL_OK")
</pallas_src>

<mosaic_0001>
module attributes {stable_mosaic.version = 11 : i64} {
  func.func @neupat_kernel(%arg0: i32, %arg1: memref<4x384xf32, #tpu.memory_space<vmem>>, %arg2: memref<16x1xf32, #tpu.memory_space<vmem>>, %arg3: memref<32x16xf32, #tpu.memory_space<vmem>>, %arg4: memref<32x16xf32, #tpu.memory_space<vmem>>, %arg5: memref<32x1xf32, #tpu.memory_space<vmem>>, %arg6: memref<32x32xf32, #tpu.memory_space<vmem>>, %arg7: memref<32x1xf32, #tpu.memory_space<vmem>>, %arg8: memref<8x32xf32, #tpu.memory_space<vmem>>, %arg9: memref<8x1xf32, #tpu.memory_space<vmem>>, %arg10: memref<8x384xf32, #tpu.memory_space<vmem>>) attributes {dimension_semantics = [#tpu.dimension_semantics<parallel>], iteration_bounds = array<i64: 1>, scalar_prefetch = 0 : i64, scratch_operands = 0 : i64, tpu.core_type = #tpu.core_type<tc>, window_params = [{transform_indices = @transform_0, window_bounds = array<i64: 4, 384>}, {pipeline_mode = #tpu.pipeline_mode<synchronous>, transform_indices = @transform_1, window_bounds = array<i64: 16, 1>}, {pipeline_mode = #tpu.pipeline_mode<synchronous>, transform_indices = @transform_2, window_bounds = array<i64: 32, 16>}, {pipeline_mode = #tpu.pipeline_mode<synchronous>, transform_indices = @transform_3, window_bounds = array<i64: 32, 16>}, {pipeline_mode = #tpu.pipeline_mode<synchronous>, transform_indices = @transform_4, window_bounds = array<i64: 32, 1>}, {pipeline_mode = #tpu.pipeline_mode<synchronous>, transform_indices = @transform_5, window_bounds = array<i64: 32, 32>}, {pipeline_mode = #tpu.pipeline_mode<synchronous>, transform_indices = @transform_6, window_bounds = array<i64: 32, 1>}, {pipeline_mode = #tpu.pipeline_mode<synchronous>, transform_indices = @transform_7, window_bounds = array<i64: 8, 32>}, {pipeline_mode = #tpu.pipeline_mode<synchronous>, transform_indices = @transform_8, window_bounds = array<i64: 8, 1>}, {transform_indices = @transform_9, window_bounds = array<i64: 8, 384>}]} {
    %c0 = arith.constant 0 : index
    %c0_0 = arith.constant 0 : index
    %0 = vector.load %arg1[%c0, %c0_0] : memref<4x384xf32, #tpu.memory_space<vmem>>, vector<4x384xf32>
    %1 = tpu.concatenate %0, %0, %0, %0 in 0 : vector<4x384xf32>, vector<4x384xf32>, vector<4x384xf32>, vector<4x384xf32> -> vector<16x384xf32>
    %c0_1 = arith.constant 0 : index
    %c0_2 = arith.constant 0 : index
    %2 = vector.load %arg2[%c0_1, %c0_2] : memref<16x1xf32, #tpu.memory_space<vmem>>, vector<16x1xf32>
    %3 = vector.broadcast %2 : vector<16x1xf32> to vector<16x384xf32>
    %4 = arith.mulf %1, %3 : vector<16x384xf32>
    %5 = math.sin %4 : vector<16x384xf32>
    %6 = math.cos %4 : vector<16x384xf32>
    %c0_3 = arith.constant 0 : index
    %c0_4 = arith.constant 0 : index
    %7 = vector.load %arg3[%c0_3, %c0_4] : memref<32x16xf32, #tpu.memory_space<vmem>>, vector<32x16xf32>
    %cst = arith.constant dense<0.000000e+00> : vector<32x384xf32>
    %8 = tpu.matmul %7, %5, %cst {dimension_numbers = #tpu.dot_dimension_numbers<[1], [0], [0], [1], [0, 0, 1, 1], [], []>} : vector<32x16xf32>, vector<16x384xf32>, vector<32x384xf32> -> vector<32x384xf32>
    %c0_5 = arith.constant 0 : index
    %c0_6 = arith.constant 0 : index
    %9 = vector.load %arg4[%c0_5, %c0_6] : memref<32x16xf32, #tpu.memory_space<vmem>>, vector<32x16xf32>
    %cst_7 = arith.constant dense<0.000000e+00> : vector<32x384xf32>
    %10 = tpu.matmul %9, %6, %cst_7 {dimension_numbers = #tpu.dot_dimension_numbers<[1], [0], [0], [1], [0, 0, 1, 1], [], []>} : vector<32x16xf32>, vector<16x384xf32>, vector<32x384xf32> -> vector<32x384xf32>
    %11 = arith.addf %8, %10 : vector<32x384xf32>
    %c0_8 = arith.constant 0 : index
    %c0_9 = arith.constant 0 : index
    %12 = vector.load %arg5[%c0_8, %c0_9] : memref<32x1xf32, #tpu.memory_space<vmem>>, vector<32x1xf32>
    %13 = vector.broadcast %12 : vector<32x1xf32> to vector<32x384xf32>
    %14 = arith.addf %11, %13 : vector<32x384xf32>
    %cst_10 = arith.constant 0.000000e+00 : f32
    %15 = vector.broadcast %cst_10 : f32 to vector<32x384xf32>
    %16 = arith.maximumf %14, %15 : vector<32x384xf32>
    %c0_11 = arith.constant 0 : index
    %c0_12 = arith.constant 0 : index
    %17 = vector.load %arg6[%c0_11, %c0_12] : memref<32x32xf32, #tpu.memory_space<vmem>>, vector<32x32xf32>
    %cst_13 = arith.constant dense<0.000000e+00> : vector<32x384xf32>
    %18 = tpu.matmul %17, %16, %cst_13 {dimension_numbers = #tpu.dot_dimension_numbers<[1], [0], [0], [1], [0, 0, 1, 1], [], []>} : vector<32x32xf32>, vector<32x384xf32>, vector<32x384xf32> -> vector<32x384xf32>
    %c0_14 = arith.constant 0 : index
    %c0_15 = arith.constant 0 : index
    %19 = vector.load %arg7[%c0_14, %c0_15] : memref<32x1xf32, #tpu.memory_space<vmem>>, vector<32x1xf32>
    %20 = vector.broadcast %19 : vector<32x1xf32> to vector<32x384xf32>
    %21 = arith.addf %18, %20 : vector<32x384xf32>
    %cst_16 = arith.constant 0.000000e+00 : f32
    %22 = vector.broadcast %cst_16 : f32 to vector<32x384xf32>
    %23 = arith.maximumf %21, %22 : vector<32x384xf32>
    %c0_17 = arith.constant 0 : index
    %c0_18 = arith.constant 0 : index
    %24 = vector.load %arg8[%c0_17, %c0_18] : memref<8x32xf32, #tpu.memory_space<vmem>>, vector<8x32xf32>
    %cst_19 = arith.constant dense<0.000000e+00> : vector<8x384xf32>
    %25 = tpu.matmul %24, %23, %cst_19 {dimension_numbers = #tpu.dot_dimension_numbers<[1], [0], [0], [1], [0, 0, 1, 1], [], []>} : vector<8x32xf32>, vector<32x384xf32>, vector<8x384xf32> -> vector<8x384xf32>
    %c0_20 = arith.constant 0 : index
    %c0_21 = arith.constant 0 : index
    %26 = vector.load %arg9[%c0_20, %c0_21] : memref<8x1xf32, #tpu.memory_space<vmem>>, vector<8x1xf32>
    %27 = vector.broadcast %26 : vector<8x1xf32> to vector<8x384xf32>
    %28 = arith.addf %25, %27 : vector<8x384xf32>
    %29 = math.absf %28 : vector<8x384xf32>
    %c0_22 = arith.constant 0 : index
    %c0_23 = arith.constant 0 : index
    %30 = vector.load %arg10[%c0_22, %c0_23] : memref<8x384xf32, #tpu.memory_space<vmem>>, vector<8x384xf32>
    tpu.vector_store %arg10[%c0_22, %c0_23], %29 {strides = array<i32>} : memref<8x384xf32, #tpu.memory_space<vmem>>, vector<8x384xf32>,
    return
  }
  func.func @transform_0(%arg0: i32) -> (i32, i32) {
    %c0_i32 = arith.constant 0 : i32
    %c0_i32_0 = arith.constant 0 : i32
    return %c0_i32, %arg0 : i32, i32
  }
  func.func @transform_1(%arg0: i32) -> (i32, i32) {
    %c0_i32 = arith.constant 0 : i32
    %c0_i32_0 = arith.constant 0 : i32
    %c0_i32_1 = arith.constant 0 : i32
    return %c0_i32, %c0_i32_0 : i32, i32
  }
  func.func @transform_2(%arg0: i32) -> (i32, i32) {
    %c0_i32 = arith.constant 0 : i32
    %c0_i32_0 = arith.constant 0 : i32
    %c0_i32_1 = arith.constant 0 : i32
    return %c0_i32, %c0_i32_0 : i32, i32
  }
  func.func @transform_3(%arg0: i32) -> (i32, i32) {
    %c0_i32 = arith.constant 0 : i32
    %c0_i32_0 = arith.constant 0 : i32
    %c0_i32_1 = arith.constant 0 : i32
    return %c0_i32, %c0_i32_0 : i32, i32
  }
  func.func @transform_4(%arg0: i32) -> (i32, i32) {
    %c0_i32 = arith.constant 0 : i32
    %c0_i32_0 = arith.constant 0 : i32
    %c0_i32_1 = arith.constant 0 : i32
    return %c0_i32, %c0_i32_0 : i32, i32
  }
  func.func @transform_5(%arg0: i32) -> (i32, i32) {
    %c0_i32 = arith.constant 0 : i32
    %c0_i32_0 = arith.constant 0 : i32
    %c0_i32_1 = arith.constant 0 : i32
    return %c0_i32, %c0_i32_0 : i32, i32
  }
  func.func @transform_6(%arg0: i32) -> (i32, i32) {
    %c0_i32 = arith.constant 0 : i32
    %c0_i32_0 = arith.constant 0 : i32
    %c0_i32_1 = arith.constant 0 : i32
    return %c0_i32, %c0_i32_0 : i32, i32
  }
  func.func @transform_7(%arg0: i32) -> (i32, i32) {
    %c0_i32 = arith.constant 0 : i32
    %c0_i32_0 = arith.constant 0 : i32
    %c0_i32_1 = arith.constant 0 : i32
    return %c0_i32, %c0_i32_0 : i32, i32
  }
  func.func @transform_8(%arg0: i32) -> (i32, i32) {
    %c0_i32 = arith.constant 0 : i32
    %c0_i32_0 = arith.constant 0 : i32
    %c0_i32_1 = arith.constant 0 : i32
    return %c0_i32, %c0_i32_0 : i32, i32
  }
  func.func @transform_9(%arg0: i32) -> (i32, i32) {
    %c0_i32 = arith.constant 0 : i32
    %c0_i32_0 = arith.constant 0 : i32
    return %c0_i32, %arg0 : i32, i32
  }
}

</mosaic_0001>

<bundles_post_ra>
// kernel: tpu_custom_call.1
= control target key start
LH: loop header
LB: loop body
LE: loop exit
PB: predicated region body
PF: predicated region fallthrough
CT: control target
= control target key end

     0   :  { %v2557_v1 = vmov 0   ;;  %s3589_s0 = inlined_call_operand.vmem [shape: f32[4,384], index: 0, kind: input, shape index: {}]   ;;  %s3590_s1 = inlined_call_operand.vmem [shape: f32[16,1], index: 1, kind: input, shape index: {}]   ;;  %s3591_s2 = inlined_call_operand.vmem [shape: f32[32,16], index: 2, kind: input, shape index: {}]   ;;  %s3592_s3 = inlined_call_operand.vmem [shape: f32[32,16], index: 3, kind: input, shape index: {}]   ;;  %s3593_s4 = inlined_call_operand.vmem [shape: f32[32,1], index: 4, kind: input, shape index: {}]   ;;  %s3594_s5 = inlined_call_operand.vmem [shape: f32[32,32], index: 5, kind: input, shape index: {}]   ;;  %s3595_s6 = inlined_call_operand.vmem [shape: f32[32,1], index: 6, kind: input, shape index: {}]   ;;  %s3596_s7 = inlined_call_operand.vmem [shape: f32[8,32], index: 7, kind: input, shape index: {}]   ;;  %s3597_s8 = inlined_call_operand.vmem [shape: f32[8,1], index: 8, kind: input, shape index: {}]   ;;  %s3598_s9 = inlined_call_operand.hbm [shape: f32[8,384], index: 9, kind: output, shape index: {}]  }
   0x1   :  { %v83_v0 = vld [vmem:[%s3590_s1 + $0x8] sm:$0xff]  ;;  %2528 = vset.pattern.permute.xlu0 %v2557_v1  ;;  %2529 = vset.pattern.permute.xlu1 %v2557_v1 }
   0x2   :  { %14 = vsyncpa [#allocation3], 0  ;;  %91 = vperm.xlu0 %2528, %v83_v0   ;;  %2530 = vset.pattern.permute.xlu2 %v2557_v1  ;;  %v82_v2 = vld [vmem:[%s3590_s1] sm:$0xff]  ;;  %v2216_v3 = vld [vmem:[%s3595_s6 + $0x18] sm:$0xff]  ;;  %vm75_vm0 = vcmask 1043456   ;;  %s2432_s12 = sshll.u32 %s3598_s9, 4  ;;  %s2433_s12 = int_to_ptr.hbm [resolvable:$true] %s2432_s12 }
   0x3   :  { %v2213_v4 = vld [vmem:[%s3595_s6] sm:$0xff]  ;;  %v34_v6 = vld [vmem:[%s3589_s0 + $0x8] sm:$0xf]  ;;  %v2558_v48 = vmov 2475754826  }
   0x4   :  { %v33_v5 = vld [vmem:[%s3589_s0] sm:$0xff]  ;;  %39 = vst [vmem:[#allocation1 + $0x10] ss:$2 sm:$0xff] %v34_v6  ;;  %v2559_v50 = vmov 2131351028  }
   0x5   :  { %37 = vst [vmem:[#allocation1] ss:$2 sm:$0xff] %v33_v5  ;;  %v2560_v52 = vmov 2102212464   ;;  %v2561_v55 = vmov 683565275  }
   0x6   :  { %v2562_v59 = vmov 920167782  }
   0xa   :  { %86 = vperm.xlu0 %2528, %v82_v2  }
   0xb   :  { %v42_v9 = vld.sshfl [vmem:[#allocation1 + $0x10] sm:$0xff pattern:$0x75316420] }
   0xc   :  { %v40_v7 = vld.sshfl [vmem:[#allocation1] sm:$0xff pattern:$0x75316420]  ;;  %v41_v8 = vld.sshfl [vmem:[#allocation1 + $0x8] sm:$0xff pattern:$0x75316420] }
   0xd   :  { %47 = vst [vmem:[#allocation1 + $0x1] ss:$2 sm:$0xff] %v33_v5 }
   0xe   :  { %49 = vst [vmem:[#allocation1 + $0x11] ss:$2 sm:$0xff] %v34_v6 }
  0x12   :  { %2234 = vperm.xlu0 %2528, %v2216_v3  }
  0x14   :  { %v50_v10 = vld.sshfl [vmem:[#allocation1] sm:$0xff pattern:$0x75316420]  ;;  %v51_v11 = vld.sshfl [vmem:[#allocation1 + $0x8] sm:$0xff pattern:$0x75316420] }
  0x15   :  { %v52_v12 = vld.sshfl [vmem:[#allocation1 + $0x10] sm:$0xff pattern:$0x75316420]  ;;  %56 = vst [vmem:[#allocation1] ss:$2 sm:$0xff] %v33_v5  ;;  %v76_v20 = vsel %vm75_vm0, %v40_v7, %v50_v10  ;;  %v77_v21 = vsel %vm75_vm0, %v41_v8, %v51_v11 }
  0x16   :  { %58 = vst [vmem:[#allocation1 + $0x10] ss:$2 sm:$0xff] %v34_v6  ;;  %v78_v22 = vsel %vm75_vm0, %v42_v9, %v52_v12  ;;  %v2563_v8 = vmov 1326507024  }
  0x1a   :  { %2219 = vperm.xlu0 %2528, %v2213_v4  }
  0x1c   :  { %v59_v13 = vld.sshfl [vmem:[#allocation1] sm:$0xff pattern:$0x75316420]  ;;  %v60_v14 = vld.sshfl [vmem:[#allocation1 + $0x8] sm:$0xff pattern:$0x75316420] }
  0x1d   :  { %v61_v15 = vld.sshfl [vmem:[#allocation1 + $0x10] sm:$0xff pattern:$0x75316420]  ;;  %66 = vst [vmem:[#allocation1 + $0x1] ss:$2 sm:$0xff] %v33_v5 }
  0x1e   :  { %68 = vst [vmem:[#allocation1 + $0x11] ss:$2 sm:$0xff] %v34_v6 }
  0x24   :  { %v70_v16 = vld.sshfl [vmem:[#allocation1 + $0x8] sm:$0xff pattern:$0x75316420]  ;;  %v69_v23 = vld.sshfl [vmem:[#allocation1] sm:$0xff pattern:$0x75316420] }
  0x25   :  { %v71_v17 = vld.sshfl [vmem:[#allocation1 + $0x10] sm:$0xff pattern:$0x75316420]  ;;  %v80_v18 = vsel %vm75_vm0, %v60_v14, %v70_v16  ;;  %v79_v24 = vsel %vm75_vm0, %v59_v13, %v69_v23 }
  0x26   :  { %v81_v19 = vsel %vm75_vm0, %v61_v15, %v71_v17 }
  0x74   :  { %v92_v25 = vpop.permute.xlu0 %91 }
  0x75   :  { %v2636_v26 = vmul.f32 %v92_v25, %v79_v24  ;;  %v2638_v27 = vmul.f32 %v92_v25, %v80_v18  ;;  %v2640_v28 = vmul.f32 %v92_v25, %v81_v19 }
  0x77   :  { %v568_v29 = vand.u32 2139095040, %v2636_v26  ;;  %v565_v40 = vand.u32 2147483647, %v2636_v26  ;;  %v723_v43 = vand.u32 2139095040, %v2638_v27  ;;  %v878_v45 = vand.u32 2139095040, %v2640_v28 }
  0x79   :  { %v569_v30 = vshrl.u32 %v568_v29, 23  ;;  %v572_v46 = vand.u32 8388607, %v565_v40  ;;  %v724_v54 = vshrl.u32 %v723_v43, 23  ;;  %v879_v62 = vshrl.u32 %v878_v45, 23 }
  0x7b   :  { %v2450_v31 = vadd.s32 4294967169, %v569_v30  ;;  %v573_v63 = vor.u32 8388608, %v572_v46  ;;  %v2453_v10 = vadd.s32 4294967169, %v724_v54  ;;  %v2456_v11 = vadd.s32 4294967169, %v879_v62 }
  0x7c   :  { %v87_v32 = vpop.permute.xlu0 %86 }
  0x7d   :  { %v575_v33 = vadd.s32 1, %v2450_v31  ;;  %v2643_v34 = vmul.f32 %v87_v32, %v76_v20  ;;  %v2645_v35 = vmul.f32 %v87_v32, %v77_v21  ;;  %v2647_v36 = vmul.f32 %v87_v32, %v78_v22 }
  0x7e   :  { %v2665_v13 = vshll.u32 %v573_v63, 8 }
  0x7f   :  { %vm576_vm1 = vcmp.gt.s32.totalorder %v575_v33, 0  ;;  %v103_v37 = vand.u32 2139095040, %v2643_v34 }
  0x80   :  { %v577_v38 = vsel %vm576_vm1, %v575_v33, 0  ;;  %v614_v29 = vand.u32 65535, %v2665_v13  ;;  %v615_v31 = vshrl.u32 %v2665_v13, 16 }
  0x81   :  { %v579_v39 = vand.u32 31, %v577_v38  ;;  %v104_v41 = vshrl.u32 %v103_v37, 23  ;;  %v578_v61 = vshrl.u32 %v577_v38, 5  ;;  %v2674_v37 = vadd.s32 1, %v2453_v10 }
  0x82   :  { %v2676_v38 = vadd.s32 1, %v2456_v11 }
  0x83   :  { %v580_v42 = vsub.s32 32, %v579_v39  ;;  %v2441_v44 = vadd.s32 4294967169, %v104_v41  ;;  %v582_v56 = vshll.u32 %v2561_v55, %v579_v39  ;;  %v585_v57 = vshll.u32 %v2558_v48, %v579_v39 }
  0x84   :  { %v588_v58 = vshll.u32 %v2559_v50, %v579_v39  ;;  %v591_v0 = vshll.u32 %v2560_v52, %v579_v39  ;;  %v594_v7 = vshll.u32 %v2562_v59, %v579_v39  ;;  %vm597_vm3 = vcmp.lt.s32.totalorder %v578_v61, 1 }
  0x85   :  { %v110_v47 = vadd.s32 1, %v2441_v44  ;;  %v583_v49 = vshrl.u32 %v2558_v48, %v580_v42  ;;  %v586_v51 = vshrl.u32 %v2559_v50, %v580_v42  ;;  %v589_v53 = vshrl.u32 %v2560_v52, %v580_v42 }
  0x86   :  { %v592_v60 = vshrl.u32 %v2562_v59, %v580_v42  ;;  %v595_v9 = vshrl.u32 %v2563_v8, %v580_v42  ;;  %v581_v15 = vshrl.u32 %v2561_v55, %v580_v42  ;;  %vm600_vm4 = vcmp.lt.s32.totalorder %v578_v61, 4 }
  0x87   :  { %vm111_vm2 = vcmp.gt.s32.totalorder %v110_v47, 0  ;;  %v584_v2 = vor.u32 %v583_v49, %v582_v56  ;;  %v587_v3 = vor.u32 %v586_v51, %v585_v57  ;;  %v590_v4 = vor.u32 %v589_v53, %v588_v58 }
  0x88   :  { %v112_v5 = vsel %vm111_vm2, %v110_v47, 0  ;;  %v593_v6 = vor.u32 %v592_v60, %v591_v0  ;;  %v596_v12 = vor.u32 %v595_v9, %v594_v7  ;;  %vm599_vm5 = vcmp.lt.s32.totalorder %v578_v61, 3 }
  0x89   :  { %v2667_v14 = vand.u32 31, %v112_v5  ;;  %v605_v16 = vsel %vm597_vm3, %v584_v2, %v587_v3  ;;  %v602_v17 = vsel %vm600_vm4, %v590_v4, 2102212464  ;;  %v609_v19 = vsel %vm597_vm3, %v587_v3, %v590_v4 }
  0x8a   :  { %v606_v18 = vsel %vm600_vm4, %v593_v6, 920167782  ;;  %vm598_vm6 = vcmp.lt.s32.totalorder %v578_v61, 2  ;;  %v601_v20 = vsel %vm597_vm3, %v581_v15, %v584_v2  ;;  %v610_v22 = vsel %vm600_vm4, %v596_v12, 1326507024 }
  0x8b   :  { %v607_v21 = vsel %vm599_vm5, %v590_v4, %v606_v18  ;;  %v603_v23 = vsel %vm599_vm5, %v587_v3, %v602_v17  ;;  %v611_v25 = vsel %vm599_vm5, %v593_v6, %v610_v22  ;;  %v2678_v42 = vshrl.u32 %v112_v5, 5 }
  0x8c   :  { %v608_v24 = vsel %vm598_vm6, %v605_v16, %v607_v21  ;;  %v612_v30 = vsel %vm598_vm6, %v609_v19, %v611_v25  ;;  %v2681_v43 = vsub.s32 32, %v2667_v14  ;;  %v2684_v46 = vsel %vm598_vm6, %v601_v20, %v603_v23 }
  0x8d   :  { %v638_v32 = vand.u32 65535, %v608_v24  ;;  %v639_v33 = vshrl.u32 %v608_v24, 16  ;;  %v616_v39 = vand.u32 65535, %v612_v30  ;;  %v617_v41 = vshrl.u32 %v612_v30, 16 }
  0x8e   :  { %v100_v51 = vand.u32 2147483647, %v2643_v34  ;;  %v117_v12 = vshll.u32 %v2561_v55, %v2667_v14  ;;  %v118_v17 = vshrl.u32 %v2558_v48, %v2681_v43  ;;  %v120_v18 = vshll.u32 %v2558_v48, %v2667_v14 }
  0x8f   :  { %v641_v44 = vmul.u32 %v639_v33, %v614_v29  ;;  %v642_v45 = vmul.u32 %v638_v32, %v615_v31  ;;  %v619_v47 = vmul.u32 %v617_v41, %v614_v29  ;;  %v620_v49 = vmul.u32 %v616_v39, %v615_v31 }
  0x90   :  { %v618_v53 = vmul.u32 %v616_v39, %v614_v29  ;;  %v640_v54 = vmul.u32 %v638_v32, %v614_v29  ;;  %v643_v56 = vmul.u32 %v639_v33, %v615_v31  ;;  %v621_v58 = vmul.u32 %v617_v41, %v615_v31 }
  0x91   :  { %v644_v57 = vshll.u32 %v641_v44, 16  ;;  %v622_v60 = vshll.u32 %v619_v47, 16  ;;  %v645_v62 = vshrl.u32 %v641_v44, 16  ;;  %v646_v63 = vshll.u32 %v642_v45, 16 }
  0x92   :  { %v623_v0 = vshrl.u32 %v619_v47, 16  ;;  %v647_v2 = vshrl.u32 %v642_v45, 16  ;;  %v624_v4 = vshll.u32 %v620_v49, 16  ;;  %v107_v9 = vand.u32 8388607, %v100_v51 }
  0x93   :  { %vm648_vm7 = vc.u32 %v640_v54, %v644_v57  ;;  %v650_v3 = vadd.s32 %v644_v57, %v640_v54  ;;  %vm626_vm8 = vc.u32 %v618_v53, %v622_v60  ;;  %v628_v61 = vadd.s32 %v622_v60, %v618_v53 }
  0x94   :  { %v649_v5 = vsel %vm648_vm7, 1, %v2557_v1  ;;  %v627_v6 = vsel %vm626_vm8, 1, %v2557_v1  ;;  %v121_v20 = vshrl.u32 %v2559_v50, %v2681_v43  ;;  %v123_v21 = vshll.u32 %v2559_v50, %v2667_v14 }
  0x95   :  { %v651_v7 = vadd.s32 %v649_v5, %v643_v56  ;;  %vm652_vm9 = vc.u32 %v650_v3, %v646_v63  ;;  %v629_v10 = vadd.s32 %v627_v6, %v621_v58  ;;  %vm630_vm10 = vc.u32 %v628_v61, %v624_v4 }
  0x96   :  { %v653_v11 = vsel %vm652_vm9, 1, %v2557_v1  ;;  %v631_v15 = vsel %vm630_vm10, 1, %v2557_v1  ;;  %v124_v22 = vshrl.u32 %v2560_v52, %v2681_v43  ;;  %v625_v23 = vshrl.u32 %v620_v49, 16 }
  0x97   :  { %v655_v16 = vadd.s32 %v653_v11, %v651_v7  ;;  %v633_v19 = vadd.s32 %v631_v15, %v629_v10  ;;  %v126_v25 = vshll.u32 %v2560_v52, %v2667_v14  ;;  %v127_v29 = vshrl.u32 %v2562_v59, %v2681_v43 }
  0x98   :  { %v2709_v31 = vor.u32 %v118_v17, %v117_v12  ;;  %v2711_v32 = vor.u32 %v121_v20, %v120_v18  ;;  %v125_v33 = vor.u32 %v124_v22, %v123_v21  ;;  %v129_v44 = vshll.u32 %v2562_v59, %v2667_v14 }
  0x99   :  { %v656_v24 = vadd.s32 %v655_v16, %v645_v62  ;;  %v634_v30 = vadd.s32 %v633_v19, %v623_v0  ;;  %v128_v41 = vor.u32 %v127_v29, %v126_v25  ;;  %v130_v45 = vshrl.u32 %v2563_v8, %v2681_v43 }
  0x9a   :  { %vm731_vm11 = vcmp.gt.s32.totalorder %v2674_v37, 0  ;;  %v2720_v49 = vadd.s32 %v650_v3, %v646_v63  ;;  %v108_v53 = vor.u32 8388608, %v107_v9  ;;  %v658_v54 = vmul.u32 %v2665_v13, %v2684_v46 }
  0x9b   :  { %v657_v39 = vadd.s32 %v656_v24, %v647_v2  ;;  %v2718_v47 = vadd.s32 %v634_v30, %v625_v23  ;;  %v131_v57 = vor.u32 %v130_v45, %v129_v44  ;;  %vm132_vm12 = vcmp.lt.s32.totalorder %v2678_v42, 1 }
  0x9c   :  { %vm133_vm14 = vcmp.lt.s32.totalorder %v2678_v42, 2  ;;  %vm135_vm15 = vcmp.lt.s32.totalorder %v2678_v42, 4  ;;  %v140_v14 = vsel %vm132_vm12, %v2709_v31, %v2711_v32  ;;  %vm134_vm0 = vcmp.lt.s32.totalorder %v2678_v42, 3 }
  0x9d   :  { %v661_v56 = vadd.s32 1, %v657_v39  ;;  %vm660_vm13 = vc.u32 %v2718_v47, %v2720_v49  ;;  %v141_v13 = vsel %vm135_vm15, %v128_v41, 920167782  ;;  %v144_v46 = vsel %vm132_vm12, %v2711_v32, %v125_v33 }
  0x9e   :  { %v142_v62 = vsel %vm134_vm0, %v125_v33, %v141_v13  ;;  %v145_v63 = vsel %vm135_vm15, %v131_v57, 1326507024  ;;  %v2743_v0 = vshll.u32 %v108_v53, 8  ;;  %v732_v2 = vsel %vm731_vm11, %v2674_v37, 0 }
  0x9f   :  { %v662_v58 = vsel %vm660_vm13, %v661_v56, %v657_v39  ;;  %vm886_vm1 = vcmp.gt.s32.totalorder %v2676_v38, 0  ;;  %v143_v3 = vsel %vm133_vm14, %v140_v14, %v142_v62  ;;  %v146_v4 = vsel %vm134_vm0, %v128_v41, %v145_v63 }
  0xa0   :  { %v663_v60 = vadd.s32 %v662_v58, %v658_v54  ;;  %v147_v5 = vsel %vm133_vm14, %v144_v46, %v146_v4  ;;  %v149_v6 = vand.u32 65535, %v2743_v0  ;;  %v150_v7 = vshrl.u32 %v2743_v0, 16 }
  0xa1   :  { %v151_v9 = vand.u32 65535, %v147_v5  ;;  %v152_v10 = vshrl.u32 %v147_v5, 16  ;;  %v174_v11 = vshrl.u32 %v143_v3, 16  ;;  %v2757_v37 = vand.u32 31, %v732_v2 }
  0xa2   :  { %v664_v61 = vadd.s32 536870912, %v663_v60  ;;  %v2760_v12 = vsel %vm886_vm1, %v2676_v38, 0  ;;  %v258_v15 = vand.u32 2139095040, %v2645_v35  ;;  %vm567_vm2 = vcmp.lt.s32.totalorder %v2636_v26, 0 }
  0xa3   :  { %v154_v17 = vmul.u32 %v152_v10, %v149_v6  ;;  %v155_v18 = vmul.u32 %v151_v9, %v150_v7  ;;  %v173_v20 = vand.u32 65535, %v143_v3  ;;  %v176_v21 = vmul.u32 %v174_v11, %v149_v6 }
  0xa4   :  { %v665_v16 = vshrl.u32 %v664_v61, 30  ;;  %v720_v22 = vand.u32 2147483647, %v2638_v27  ;;  %v2765_v23 = vshrl.u32 %v732_v2, 5  ;;  %v2768_v24 = vand.u32 31, %v2760_v12 }
  0xa5   :  { %v153_v25 = vmul.u32 %v151_v9, %v149_v6  ;;  %v157_v38 = vshll.u32 %v154_v17, 16  ;;  %v2771_v29 = vsub.s32 32, %v2757_v37  ;;  %v2773_v30 = vshrl.u32 %v258_v15, 23 }
  0xa6   :  { %v666_v19 = vshll.u32 %v665_v16, 30  ;;  %v116_v41 = vshrl.u32 %v2561_v55, %v2681_v43  ;;  %vm2779_vm3 = vcmp.le.f32.partialorder %v565_v40, 0.7853982  ;;  %v137_v45 = vsel %vm135_vm15, %v125_v33, 2102212464 }
  0xa7   :  { %v159_v53 = vshll.u32 %v155_v18, 16  ;;  %vm161_vm4 = vc.u32 %v153_v25, %v157_v38  ;;  %v163_v54 = vadd.s32 %v157_v38, %v153_v25  ;;  %v177_v57 = vmul.u32 %v173_v20, %v150_v7 }
  0xa8   :  { %v667_v39 = vsub.s32 %v663_v60, %v666_v19  ;;  %v179_v14 = vshll.u32 %v176_v21, 16  ;;  %v689_v58 = vsub.s32 4, %v665_v16  ;;  %v156_v13 = vmul.u32 %v152_v10, %v150_v7 }
  0xa9   :  { %v162_v43 = vsel %vm161_vm4, 1, %v2557_v1  ;;  %vm165_vm6 = vc.u32 %v163_v54, %v159_v53  ;;  %v136_v40 = vsel %vm132_vm12, %v116_v41, %v2709_v31  ;;  %v138_v33 = vsel %vm134_vm0, %v2711_v32, %v137_v45 }
  0xaa   :  { %vm668_vm5 = vcmp.lt.s32.totalorder %v667_v39, 0  ;;  %v669_v56 = vsub.s32 0, %v667_v39  ;;  %v175_v60 = vmul.u32 %v173_v20, %v149_v6  ;;  %v413_v62 = vand.u32 2139095040, %v2647_v36 }
  0xab   :  { %v164_v2 = vadd.s32 %v162_v43, %v156_v13  ;;  %v166_v3 = vsel %vm165_vm6, 1, %v2557_v1  ;;  %v659_v4 = vadd.s32 %v2720_v49, %v2718_v47  ;;  %v181_v61 = vshll.u32 %v177_v57, 16 }
  0xac   :  { %v670_v46 = vsel %vm668_vm5, %v669_v56, %v667_v39  ;;  %vm183_vm7 = vc.u32 %v175_v60, %v179_v14  ;;  %v185_v5 = vadd.s32 %v179_v14, %v175_v60  ;;  %v690_v31 = vsel %vm567_vm2, %v689_v58, %v665_v16 }
  0xad   :  { %v671_v63 = vclz %v670_v46  ;;  %v139_v32 = vsel %vm133_vm14, %v136_v40, %v138_v33  ;;  %v178_v6 = vmul.u32 %v174_v11, %v150_v7  ;;  %v158_v10 = vshrl.u32 %v154_v17, 16 }
  0xae   :  { %v168_v15 = vadd.s32 %v166_v3, %v164_v2  ;;  %v184_v19 = vsel %vm183_vm7, 1, %v2557_v1  ;;  %vm187_vm8 = vc.u32 %v185_v5, %v181_v61  ;;  %v727_v49 = vand.u32 8388607, %v720_v22 }
  0xaf   :  { %v2451_v9 = vadd.s32 4294967294, %v671_v63  ;;  %v186_v20 = vadd.s32 %v184_v19, %v178_v6  ;;  %v188_v47 = vsel %vm187_vm8, 1, %v2557_v1  ;;  %v2806_v16 = vsel %vm2779_vm3, 0, %v690_v31 }
  0xb0   :  { %v160_v42 = vshrl.u32 %v155_v18, 16  ;;  %v169_v38 = vadd.s32 %v168_v15, %v158_v10  ;;  %v180_v17 = vshrl.u32 %v176_v21, 16  ;;  %v182_v54 = vshrl.u32 %v177_v57, 16 }
  0xb1   :  { %vm2452_vm9 = vcmp.lt.s32.totalorder %v2451_v9, 0  ;;  %v190_v41 = vadd.s32 %v188_v47, %v186_v20  ;;  %v2810_v56 = vadd.s32 %v185_v5, %v181_v61  ;;  %v741_v43 = vshrl.u32 %v2559_v50, %v2771_v29 }
  0xb2   :  { %v674_v25 = vsel %vm2452_vm9, 0, %v2451_v9  ;;  %v2808_v53 = vadd.s32 %v169_v38, %v160_v42  ;;  %v738_v18 = vshrl.u32 %v2558_v48, %v2771_v29  ;;  %v740_v46 = vshll.u32 %v2558_v48, %v2757_v37 }
  0xb3   :  { %v675_v7 = vsub.s32 32, %v674_v25  ;;  %v679_v11 = vsub.s32 4294967266, %v674_v25  ;;  %v676_v45 = vshll.u32 %v667_v39, %v674_v25  ;;  %v191_v13 = vadd.s32 %v190_v41, %v180_v17 }
  0xb4   :  { %v743_v21 = vshll.u32 %v2559_v50, %v2757_v37  ;;  %v744_v39 = vshrl.u32 %v2560_v52, %v2771_v29  ;;  %vm195_vm10 = vc.u32 %v2808_v53, %v2810_v56  ;;  %v746_v60 = vshll.u32 %v2560_v52, %v2757_v37 }
  0xb5   :  { %v677_v14 = vshrl.u32 %v659_v4, %v675_v7  ;;  %v680_v58 = vadd.s32 127, %v679_v11  ;;  %v192_v33 = vadd.s32 %v191_v13, %v182_v54  ;;  %v747_v63 = vshrl.u32 %v2562_v59, %v2771_v29 }
  0xb6   :  { %v749_v2 = vshll.u32 %v2562_v59, %v2757_v37  ;;  %v750_v3 = vshrl.u32 %v2563_v8, %v2771_v29  ;;  %v742_v5 = vor.u32 %v741_v43, %v740_v46  ;;  %v745_v9 = vor.u32 %v744_v39, %v743_v21 }
  0xb7   :  { %v678_v57 = vor.u32 %v677_v14, %v676_v45  ;;  %v681_v40 = vshll.u32 %v680_v58, 23  ;;  %v196_v61 = vadd.s32 1, %v192_v33  ;;  %v193_v31 = vmul.u32 %v2743_v0, %v139_v32 }
  0xb8   :  { %v728_v6 = vor.u32 8388608, %v727_v49  ;;  %v748_v10 = vor.u32 %v747_v63, %v746_v60  ;;  %v751_v15 = vor.u32 %v750_v3, %v749_v2  ;;  %v737_v25 = vshll.u32 %v2561_v55, %v2757_v37 }
  0xb9   :  { %v682_v4 = vor.u32 4788187, %v681_v40  ;;  %v685_v20 = vcvt.s32.f32 %v678_v57  ;;  %v197_v47 = vsel %vm195_vm10, %v196_v61, %v192_v33  ;;  %v2444_v42 = vadd.s32 4294967169, %v2773_v30 }
  0xba   :  { %v709_v38 = vadd.s32 3, %v2806_v16  ;;  %v198_v7 = vadd.s32 %v197_v47, %v193_v31  ;;  %vm752_vm11 = vcmp.lt.s32.totalorder %v2765_v23, 1  ;;  %v739_v17 = vor.u32 %v738_v18, %v737_v25 }
  0xbb   :  { %v683_v19 = vand.u32 2147483647, %v682_v4  ;;  %vm755_vm12 = vcmp.lt.s32.totalorder %v2765_v23, 4  ;;  %v764_v0 = vsel %vm752_vm11, %v742_v5, %v745_v9  ;;  %vm754_vm13 = vcmp.lt.s32.totalorder %v2765_v23, 3 }
  0xbc   :  { %v199_v32 = vadd.s32 536870912, %v198_v7  ;;  %v761_v37 = vsel %vm755_vm12, %v748_v10, 920167782  ;;  %v765_v30 = vsel %vm755_vm12, %v751_v15, 1326507024  ;;  %vm753_vm14 = vcmp.lt.s32.totalorder %v2765_v23, 2 }
  0xbd   :  { %v686_v11 = vmul.f32 %v685_v20, %v683_v19  ;;  %v766_v41 = vsel %vm754_vm13, %v748_v10, %v765_v30  ;;  %v2849_v45 = vshll.u32 %v728_v6, 8  ;;  %v2852_v54 = vsub.s32 32, %v2768_v24 }
  0xbe   :  { %v2856_v14 = vshrl.u32 %v413_v62, 23  ;;  %v2858_v58 = vshrl.u32 %v199_v32, 30  ;;  %v767_v13 = vsel %vm753_vm14, %v764_v0, %v766_v41  ;;  %v760_v18 = vsel %vm752_vm11, %v739_v17, %v742_v5 }
  0xbf   :  { %v687_v49 = vxor.u32 2147483648, %v686_v11  ;;  %v762_v46 = vsel %vm754_vm13, %v745_v9, %v761_v37  ;;  %v769_v21 = vand.u32 65535, %v2849_v45  ;;  %v771_v57 = vand.u32 65535, %v767_v13 }
  0xc0   :  { %v201_v39 = vshll.u32 %v2858_v58, 30  ;;  %v772_v40 = vshrl.u32 %v767_v13, 16  ;;  %v2875_v33 = vadd.s32 1, %v2444_v42  ;;  %v2880_v63 = vand.u32 3, %v2806_v16 }
  0xc1   :  { %v688_v43 = vsel %vm567_vm2, %v687_v49, %v686_v11  ;;  %v2882_v2 = vand.u32 3, %v709_v38  ;;  %v736_v44 = vshrl.u32 %v2561_v55, %v2771_v29  ;;  %v2889_v4 = vshrl.u32 %v2849_v45, 16 }
  0xc2   :  { %v2872_v62 = vsel %vm2779_vm3, %v2636_v26, %v688_v43  ;;  %v2884_v3 = vsub.s32 %v198_v7, %v201_v39  ;;  %v2891_v61 = vmul.u32 %v772_v40, %v769_v21  ;;  %vm102_vm15 = vcmp.lt.s32.totalorder %v2643_v34, 0 }
  0xc3   :  { %v693_v60 = vmul.f32 %v2872_v62, %v2872_v62  ;;  %v757_v16 = vsel %vm755_vm12, %v745_v9, 2102212464  ;;  %v763_v10 = vsel %vm753_vm14, %v760_v18, %v762_v46  ;;  %v194_v15 = vadd.s32 %v2810_v56, %v2808_v53 }
  0xc4   :  { %vm203_vm0 = vcmp.lt.s32.totalorder %v2884_v3, 0  ;;  %v204_v29 = vsub.s32 0, %v2884_v3  ;;  %v2903_v19 = vmul.u32 %v771_v57, %v2889_v4  ;;  %v756_v25 = vsel %vm752_vm11, %v736_v44, %v739_v17 }
  0xc5   :  { %v694_v31 = vmul.f32 -0.001358992, %v693_v60  ;;  %v701_v6 = vmul.f32 -0.00019511016, %v693_v60  ;;  %v777_v9 = vshll.u32 %v2891_v61, 16  ;;  %v758_v38 = vsel %vm754_vm13, %v742_v5, %v757_v16 }
  0xc6   :  { %v205_v42 = vsel %vm203_vm0, %v204_v29, %v2884_v3  ;;  %v773_v53 = vmul.u32 %v771_v57, %v769_v21  ;;  %v794_v56 = vshrl.u32 %v763_v10, 16  ;;  %v793_v32 = vand.u32 65535, %v763_v10 }
  0xc7   :  { %v695_v20 = vadd.f32 0.041655596, %v694_v31  ;;  %v702_v47 = vadd.f32 0.008332121, %v701_v6  ;;  %v206_v0 = vclz %v205_v42  ;;  %vm1641_vm1 = vcmp.eq.s32.totalorder %v2880_v63, 2 }
  0xc8   :  { %v224_v37 = vsub.s32 4, %v2858_v58  ;;  %v779_v30 = vshll.u32 %v2903_v19, 16  ;;  %vm781_vm2 = vc.u32 %v773_v53, %v777_v9  ;;  %v783_v17 = vadd.s32 %v777_v9, %v773_v53 }
  0xc9   :  { %v696_v7 = vmul.f32 %v695_v20, %v693_v60  ;;  %v703_v11 = vmul.f32 %v702_v47, %v693_v60  ;;  %v2442_v13 = vadd.s32 4294967294, %v206_v0  ;;  %v776_v43 = vmul.u32 %v772_v40, %v2889_v4 }
  0xca   :  { %vm1638_vm3 = vcmp.eq.s32.totalorder %v2880_v63, 0  ;;  %vm712_vm4 = vcmp.eq.s32.totalorder %v2882_v2, 0  ;;  %vm715_vm5 = vcmp.eq.s32.totalorder %v2882_v2, 2  ;;  %v2920_v5 = vsel %vm753_vm14, %v756_v25, %v758_v38 }
  0xcb   :  { %v697_v49 = vadd.f32 -0.4999988, %v696_v7  ;;  %v704_v41 = vadd.f32 -0.16666654, %v703_v11  ;;  %v782_v18 = vsel %vm781_vm2, 1, %v2557_v1  ;;  %vm785_vm6 = vc.u32 %v783_v17, %v779_v30 }
  0xcc   :  { %v2923_v46 = vmul.u32 %v794_v56, %v769_v21  ;;  %vm1637_vm7 = vcmp.lt.s32.totalorder %v2880_v63, 2  ;;  %vm711_vm8 = vcmp.lt.s32.totalorder %v2882_v2, 2  ;;  %vm2929_vm9 = vcmp.le.f32.partialorder %v100_v51, 0.7853982 }
  0xcd   :  { %v698_v39 = vmul.f32 %v697_v49, %v693_v60  ;;  %v705_v57 = vmul.f32 %v704_v41, %v693_v60  ;;  %vm2443_vm10 = vcmp.lt.s32.totalorder %v2442_v13, 0  ;;  %v784_v23 = vadd.s32 %v782_v18, %v776_v43 }
  0xce   :  { %vm708_vm11 = vweird.f32 %v2636_v26  ;;  %v209_v44 = vsel %vm2443_vm10, 0, %v2442_v13  ;;  %v225_v31 = vsel %vm102_vm15, %v224_v37, %v2858_v58  ;;  %v786_v60 = vsel %vm785_vm6, 1, %v2557_v1 }
  0xcf   :  { %v795_v6 = vmul.u32 %v793_v32, %v769_v21  ;;  %vm266_vm12 = vcmp.gt.s32.totalorder %v2875_v33, 0  ;;  %v699_v16 = vadd.f32 1.0, %v698_v39  ;;  %v706_v10 = vadd.f32 1.0, %v705_v57 }
  0xd0   :  { %v210_v51 = vsub.s32 32, %v209_v44  ;;  %v797_v29 = vmul.u32 %v793_v32, %v2889_v4  ;;  %v214_v20 = vsub.s32 4294967266, %v209_v44  ;;  %v778_v47 = vshrl.u32 %v2891_v61, 16 }
  0xd1   :  { %v788_v25 = vadd.s32 %v786_v60, %v784_v23  ;;  %v799_v9 = vshll.u32 %v2923_v46, 16  ;;  %v707_v42 = vmul.f32 %v706_v10, %v2872_v62  ;;  %v716_v38 = vxor.u32 2147483648, %v699_v16 }
  0xd2   :  { %v212_v58 = vshrl.u32 %v194_v15, %v210_v51  ;;  %v780_v53 = vshrl.u32 %v2903_v19, 16  ;;  %v211_v21 = vshll.u32 %v2884_v3, %v209_v44  ;;  %v215_v7 = vadd.s32 127, %v214_v20 }
  0xd3   :  { %v798_v11 = vmul.u32 %v794_v56, %v2889_v4  ;;  %vm803_vm13 = vc.u32 %v795_v6, %v799_v9  ;;  %v713_v0 = vxor.u32 2147483648, %v707_v42  ;;  %v1643_v32 = vsel %vm1641_vm1, %v716_v38, %v707_v42 }
  0xd4   :  { %v789_v61 = vadd.s32 %v788_v25, %v778_v47  ;;  %v801_v37 = vshll.u32 %v797_v29, 16  ;;  %v213_v30 = vor.u32 %v212_v58, %v211_v21  ;;  %v216_v17 = vshll.u32 %v215_v7, 23 }
  0xd5   :  { %v804_v62 = vsel %vm803_vm13, 1, %v2557_v1  ;;  %v805_v49 = vadd.s32 %v799_v9, %v795_v6  ;;  %v1640_v15 = vsel %vm1638_vm3, %v699_v16, %v713_v0  ;;  %v714_v3 = vsel %vm712_vm4, %v699_v16, %v713_v0 }
  0xd6   :  { %v717_v4 = vsel %vm715_vm5, %v716_v38, %v707_v42  ;;  %v806_v19 = vadd.s32 %v804_v62, %v798_v11  ;;  %v1644_v56 = vsel %vm1637_vm7, %v1640_v15, %v1643_v32  ;;  %v217_v13 = vor.u32 4788187, %v216_v17 }
  0xd7   :  { %v718_v41 = vsel %vm711_vm8, %v714_v3, %v717_v4  ;;  %v227_v43 = vsel %vm2929_vm9, 0, %v225_v31  ;;  %v1645_v18 = vsel %vm708_vm11, nan, %v1644_v56  ;;  %v2965_v57 = vadd.s32 %v789_v61, %v780_v53 }
  0xd8   :  { %v719_v39 = vsel %vm708_vm11, nan, %v718_v41  ;;  %vm807_vm14 = vc.u32 %v805_v49, %v801_v37  ;;  %1989 = vmatpush.msra.mxu0 %v1645_v18  ;;  %2516 = vmatpush.msra.mxu1 %v1645_v18  ;;  %v218_v63 = vand.u32 2147483647, %v217_v13  ;;  %v220_v23 = vcvt.s32.f32 %v213_v30 }
  0xd9   :  { %v808_v2 = vsel %vm807_vm14, 1, %v2557_v1  ;;  %v875_v44 = vand.u32 2147483647, %v2640_v28  ;;  %v2970_v60 = vshrl.u32 %v2760_v12, 5  ;;  %2517 = vmatpush.msra.mxu2 %v1645_v18  ;;  %2088 = vmatpush.msra.mxu3 %v719_v39  ;;  %v800_v31 = vshrl.u32 %v2923_v46, 16 }
  0xda   :  { %v2973_v26 = vadd.s32 %v805_v49, %v801_v37  ;;  %v810_v6 = vadd.s32 %v808_v2, %v806_v19  ;;  %v2978_v16 = vsel %vm266_vm12, %v2875_v33, 0  ;;  %v2447_v10 = vadd.s32 4294967169, %v2856_v14 }
  0xdb   :  { %v221_v51 = vmul.f32 %v220_v23, %v218_v63  ;;  %v244_v20 = vadd.s32 3, %v227_v43  ;;  %v802_v47 = vshrl.u32 %v797_v29, 16  ;;  %v813_v12 = vmul.u32 %v2849_v45, %v2920_v5 }
  0xdc   :  { %v811_v25 = vadd.s32 %v810_v6, %v800_v31  ;;  %vm815_vm0 = vc.u32 %v2965_v57, %v2973_v26  ;;  %v882_v9 = vand.u32 8388607, %v875_v44  ;;  %v892_v33 = vshll.u32 %v2561_v55, %v2768_v24 }
  0xdd   :  { %v222_v46 = vxor.u32 2147483648, %v221_v51  ;;  %v893_v14 = vshrl.u32 %v2558_v48, %v2852_v54  ;;  %v895_v29 = vshll.u32 %v2558_v48, %v2768_v24  ;;  %v896_v45 = vshrl.u32 %v2559_v50, %v2852_v54 }
  0xde   :  { %v812_v42 = vadd.s32 %v811_v25, %v802_v47  ;;  %v899_v5 = vshrl.u32 %v2560_v52, %v2852_v54  ;;  %v898_v58 = vshll.u32 %v2559_v50, %v2768_v24  ;;  %v901_v53 = vshll.u32 %v2560_v52, %v2768_v24 }
  0xdf   :  { %v223_v38 = vsel %vm102_vm15, %v222_v46, %v221_v51  ;;  %v902_v21 = vshrl.u32 %v2562_v59, %v2852_v54  ;;  %v904_v0 = vshll.u32 %v2562_v59, %v2768_v24  ;;  %v905_v32 = vshrl.u32 %v2563_v8, %v2852_v54 }
  0xe0   :  { %v3008_v7 = vsel %vm2929_vm9, %v2643_v34, %v223_v38  ;;  %v816_v11 = vadd.s32 1, %v812_v42  ;;  %v883_v37 = vor.u32 8388608, %v882_v9  ;;  %v3016_v30 = vor.u32 %v893_v14, %v892_v33 }
  0xe1   :  { %v228_v61 = vmul.f32 %v3008_v7, %v3008_v7  ;;  %v903_v17 = vor.u32 %v902_v21, %v901_v53  ;;  %v3021_v62 = vor.u32 %v896_v45, %v895_v29  ;;  %v900_v49 = vor.u32 %v899_v5, %v898_v58 }
  0xe2   :  { %v817_v40 = vsel %vm815_vm0, %v816_v11, %v812_v42  ;;  %v906_v15 = vor.u32 %v905_v32, %v904_v0  ;;  %vm910_vm15 = vcmp.lt.s32.totalorder %v2970_v60, 4  ;;  %v3024_v19 = vand.u32 3, %v227_v43 }
  0xe3   :  { %v229_v3 = vmul.f32 -0.001358992, %v228_v61  ;;  %v236_v24 = vmul.f32 -0.00019511016, %v228_v61  ;;  %v818_v4 = vadd.s32 %v817_v40, %v813_v12  ;;  %v3026_v56 = vand.u32 3, %v244_v20 }
  0xe4   :  { %vm907_vm1 = vcmp.lt.s32.totalorder %v2970_v60, 1  ;;  %v916_v41 = vsel %vm910_vm15, %v903_v17, 920167782  ;;  %vm909_vm2 = vcmp.lt.s32.totalorder %v2970_v60, 3  ;;  %v920_v23 = vsel %vm910_vm15, %v906_v15, 1326507024 }
  0xe5   :  { %v230_v13 = vadd.f32 0.041655596, %v229_v3  ;;  %v237_v18 = vadd.f32 0.008332121, %v236_v24  ;;  %v819_v39 = vadd.s32 536870912, %v818_v4  ;;  %v915_v63 = vsel %vm907_vm1, %v3016_v30, %v3021_v62 }
  0xe6   :  { %v917_v43 = vsel %vm909_vm2, %v900_v49, %v916_v41  ;;  %v3040_v2 = vshll.u32 %v883_v37, 8  ;;  %v919_v20 = vsel %vm907_vm1, %v3021_v62, %v900_v49  ;;  %v3048_v47 = vand.u32 31, %v2978_v16 }
  0xe7   :  { %v231_v31 = vmul.f32 %v230_v13, %v228_v61  ;;  %v238_v6 = vmul.f32 %v237_v18, %v228_v61  ;;  %v3042_v51 = vshrl.u32 %v819_v39, 30  ;;  %v3050_v25 = vadd.s32 1, %v2447_v10 }
  0xe8   :  { %vm908_vm3 = vcmp.lt.s32.totalorder %v2970_v60, 2  ;;  %v921_v12 = vsel %vm909_vm2, %v903_v17, %v920_v23  ;;  %vm1179_vm4 = vcmp.eq.s32.totalorder %v3024_v19, 2  ;;  %vm1176_vm5 = vcmp.eq.s32.totalorder %v3024_v19, 0 }
  0xe9   :  { %v232_v46 = vadd.f32 -0.4999988, %v231_v31  ;;  %v239_v9 = vadd.f32 -0.16666654, %v238_v6  ;;  %v821_v33 = vshll.u32 %v3042_v51, 30  ;;  %v3059_v14 = vsel %vm908_vm3, %v915_v63, %v917_v43 }
  0xea   :  { %vm247_vm6 = vcmp.eq.s32.totalorder %v3026_v56, 0  ;;  %vm250_vm7 = vcmp.eq.s32.totalorder %v3026_v56, 2  ;;  %v891_v10 = vshrl.u32 %v2561_v55, %v2852_v54  ;;  %v922_v42 = vsel %vm908_vm3, %v919_v20, %v921_v12 }
  0xeb   :  { %v924_v29 = vand.u32 65535, %v3040_v2  ;;  %v233_v45 = vmul.f32 %v232_v46, %v228_v61  ;;  %v240_v5 = vmul.f32 %v239_v9, %v228_v61  ;;  %vm1175_vm8 = vcmp.lt.s32.totalorder %v3024_v19, 2  ;;  %v3120_v19 = vld [vmem:[%s3592_s3 + $0x10] sm:$0xff] }
  0xec   :  { %vm246_vm9 = vcmp.lt.s32.totalorder %v3026_v56, 2  ;;  %v3071_v38 = vsub.s32 %v818_v4, %v821_v33  ;;  %v925_v58 = vshrl.u32 %v3040_v2, 16  ;;  %vm243_vm10 = vweird.f32 %v2643_v34 }
  0xed   :  { %v926_v53 = vand.u32 65535, %v922_v42  ;;  %v927_v21 = vshrl.u32 %v922_v42, 16  ;;  %v948_v54 = vand.u32 65535, %v3059_v14  ;;  %v949_v11 = vshrl.u32 %v3059_v14, 16 }
  0xee   :  { %v234_v0 = vadd.f32 1.0, %v233_v45  ;;  %v241_v32 = vadd.f32 1.0, %v240_v5  ;;  %vm823_vm11 = vcmp.lt.s32.totalorder %v3071_v38, 0  ;;  %v824_v61 = vsub.s32 0, %v3071_v38 }
  0xef   :  { %vm1962_vm12 = vcmask 130048   ;;  %v814_v37 = vadd.s32 %v2973_v26, %v2965_v57  ;;  %v929_v17 = vmul.u32 %v927_v21, %v924_v29  ;;  %v3081_v40 = vmul.u32 %v926_v53, %v925_v58 }
  0xf0   :  { %v242_v15 = vmul.f32 %v241_v32, %v3008_v7  ;;  %v251_v3 = vxor.u32 2147483648, %v234_v0  ;;  %v825_v24 = vsel %vm823_vm11, %v824_v61, %v3071_v38  ;;  %v911_v4 = vsel %vm907_vm1, %v891_v10, %v3016_v30  ;;  %v3115_v10 = vld [vmem:[%s3592_s3] sm:$0xff] }
  0xf1   :  { %v826_v41 = vclz %v825_v24  ;;  %v912_v13 = vsel %vm910_vm15, %v900_v49, 2102212464  ;;  %v3090_v18 = vmul.u32 %v949_v11, %v924_v29  ;;  %v3092_v39 = vmul.u32 %v948_v54, %v925_v58 }
  0xf2   :  { %v248_v57 = vxor.u32 2147483648, %v242_v15  ;;  %v928_v26 = vmul.u32 %v926_v53, %v924_v29  ;;  %v931_v63 = vmul.u32 %v927_v21, %v925_v58  ;;  %v932_v43 = vshll.u32 %v929_v17, 16 }
  0xf3   :  { %v1181_v7 = vsel %vm1179_vm4, %v251_v3, %v242_v15  ;;  %v252_v23 = vsel %vm250_vm7, %v251_v3, %v242_v15  ;;  %v2454_v31 = vadd.s32 4294967294, %v826_v41  ;;  %v934_v30 = vshll.u32 %v3081_v40, 16 }
  0xf4   :  { %v1178_v49 = vsel %vm1176_vm5, %v234_v0, %v248_v57  ;;  %v249_v6 = vsel %vm247_vm6, %v234_v0, %v248_v57  ;;  %vm936_vm13 = vc.u32 %v928_v26, %v932_v43  ;;  %v938_v20 = vadd.s32 %v932_v43, %v928_v26 }
  0xf5   :  { %v1182_v12 = vsel %vm1175_vm8, %v1178_v49, %v1181_v7  ;;  %v253_v46 = vsel %vm246_vm9, %v249_v6, %v252_v23  ;;  %vm2455_vm14 = vcmp.lt.s32.totalorder %v2454_v31, 0  ;;  %v937_v9 = vsel %vm936_vm13, 1, %v2557_v1 }
  0xf6   :  { %v1183_v33 = vsel %vm243_vm10, nan, %v1182_v12  ;;  %v254_v14 = vsel %vm243_vm10, nan, %v253_v46  ;;  %v829_v56 = vsel %vm2455_vm14, 0, %v2454_v31  ;;  %v939_v42 = vadd.s32 %v937_v9, %v931_v63 }
  0xf7   :  { %1990 = vmatpush.msra.mxu0 %v1183_v33  ;;  %2518 = vmatpush.msra.mxu1 %v1183_v33  ;;  %v830_v45 = vsub.s32 32, %v829_v56  ;;  %v834_v5 = vsub.s32 4294967266, %v829_v56  ;;  %v913_v34 = vsel %vm909_vm2, %v3021_v62, %v912_v13  ;;  %vm940_vm0 = vc.u32 %v938_v20, %v934_v30 }
  0xf8   :  { %2519 = vmatpush.msra.mxu2 %v1183_v33  ;;  %2089 = vmatpush.msra.mxu3 %v254_v14  ;;  %v933_v53 = vshrl.u32 %v929_v17, 16  ;;  %v941_v21 = vsel %vm940_vm0, 1, %v2557_v1  ;;  %v950_v0 = vmul.u32 %v948_v54, %v924_v29  ;;  %v954_v32 = vshll.u32 %v3090_v18, 16 }
  0xf9   :  { %2477 = vmatmul.msk.f32.vlgmr.msra.gmra.mxu0 %vm1962_vm12, %v3115_v10  ;;  %2479 = vmatmul.msk.f32.vlgmr.msra.gmra.mxu1 %vm1962_vm12, %v3120_v19  ;;  %v831_v61 = vshll.u32 %v3071_v38, %v829_v56  ;;  %v832_v15 = vshrl.u32 %v814_v37, %v830_v45  ;;  %v835_v3 = vadd.s32 127, %v834_v5  ;;  %v943_v62 = vadd.s32 %v941_v21, %v939_v42 }
  0xfa   :  { %v953_v24 = vmul.u32 %v949_v11, %v925_v58  ;;  %v956_v41 = vshll.u32 %v3092_v39, 16  ;;  %vm958_vm15 = vc.u32 %v950_v0, %v954_v32  ;;  %v960_v17 = vadd.s32 %v954_v32, %v950_v0 }
  0xfb   :  { %v833_v13 = vor.u32 %v832_v15, %v831_v61  ;;  %v836_v29 = vshll.u32 %v835_v3, 23  ;;  %v944_v54 = vadd.s32 %v943_v62, %v933_v53  ;;  %v959_v57 = vsel %vm958_vm15, 1, %v2557_v1 }
  0xfc   :  { %v844_v26 = vsub.s32 4, %v3042_v51  ;;  %v935_v63 = vshrl.u32 %v3081_v40, 16  ;;  %v961_v43 = vadd.s32 %v959_v57, %v953_v24  ;;  %vm962_vm1 = vc.u32 %v960_v17, %v956_v41 }
  0xfd   :  { %v3137_v38 = vshrl.u32 %v2978_v16, 5  ;;  %v3140_v58 = vsub.s32 32, %v3048_v47  ;;  %v837_v11 = vor.u32 4788187, %v836_v29  ;;  %v963_v37 = vsel %vm962_vm1, 1, %v2557_v1 }
  0xfe   :  { %v914_v7 = vsel %vm908_vm3, %v911_v4, %v913_v34  ;;  %v3145_v23 = vadd.s32 %v944_v54, %v935_v63  ;;  %v955_v31 = vshrl.u32 %v3090_v18, 16  ;;  %v965_v30 = vadd.s32 %v963_v37, %v961_v43 }
  0xff   :  { %vm421_vm2 = vcmp.gt.s32.totalorder %v3050_v25, 0  ;;  %vm3151_vm4 = vcmp.le.f32.partialorder %v720_v22, 0.7853982  ;;  %vm722_vm5 = vcmp.lt.s32.totalorder %v2638_v27, 0  ;;  %v838_v40 = vand.u32 2147483647, %v837_v11 }
 0x100   :  { %v840_v49 = vcvt.s32.f32 %v833_v13  ;;  %v845_v60 = vsel %vm722_vm5, %v844_v26, %v3042_v51  ;;  %v957_v4 = vshrl.u32 %v3092_v39, 16  ;;  %v3160_v18 = vadd.s32 %v960_v17, %v956_v41 }
 0x101   :  { %v966_v6 = vadd.s32 %v965_v30, %v955_v31  ;;  %v968_v12 = vmul.u32 %v3040_v2, %v914_v7  ;;  %v255_v22 = vand.u32 2147483647, %v2645_v35  ;;  %v273_v46 = vshrl.u32 %v2558_v48, %v3140_v58 }
 0x102   :  { %v841_v20 = vmul.f32 %v840_v49, %v838_v40  ;;  %vm970_vm3 = vc.u32 %v3145_v23, %v3160_v18  ;;  %v272_v51 = vshll.u32 %v2561_v55, %v3048_v47  ;;  %v276_v39 = vshrl.u32 %v2559_v50, %v3140_v58 }
 0x103   :  { %v967_v9 = vadd.s32 %v966_v6, %v957_v4  ;;  %v279_v14 = vshrl.u32 %v2560_v52, %v3140_v58  ;;  %v281_v2 = vshll.u32 %v2560_v52, %v3048_v47  ;;  %v282_v56 = vshrl.u32 %v2562_v59, %v3140_v58 }
 0x104   :  { %v842_v33 = vxor.u32 2147483648, %v841_v20  ;;  %v275_v45 = vshll.u32 %v2558_v48, %v3048_v47  ;;  %v284_v5 = vshll.u32 %v2562_v59, %v3048_v47  ;;  %v285_v34 = vshrl.u32 %v2563_v8, %v3140_v58 }
 0x105   :  { %v971_v42 = vadd.s32 1, %v967_v9  ;;  %v274_v21 = vor.u32 %v273_v46, %v272_v51  ;;  %v278_v0 = vshll.u32 %v2559_v50, %v3048_v47  ;;  %v283_v32 = vor.u32 %v282_v56, %v281_v2 }
 0x106   :  { %v843_v53 = vsel %vm722_vm5, %v842_v33, %v841_v20  ;;  %v3194_v3 = vor.u32 %v276_v39, %v275_v45  ;;  %v286_v62 = vor.u32 %v285_v34, %v284_v5  ;;  %vm290_vm6 = vcmp.lt.s32.totalorder %v3137_v38, 4 }
 0x107   :  { %v846_v61 = vsel %vm3151_vm4, %v2638_v27, %v843_v53  ;;  %v972_v15 = vsel %vm970_vm3, %v971_v42, %v967_v9  ;;  %v280_v17 = vor.u32 %v279_v14, %v278_v0  ;;  %v847_v47 = vsel %vm3151_vm4, 0, %v845_v60 }
 0x108   :  { %v848_v24 = vmul.f32 %v846_v61, %v846_v61  ;;  %v973_v41 = vadd.s32 %v972_v15, %v968_v12  ;;  %v262_v13 = vand.u32 8388607, %v255_v22  ;;  %v296_v29 = vsel %vm290_vm6, %v283_v32, 920167782 }
 0x109   :  { %vm287_vm7 = vcmp.lt.s32.totalorder %v3137_v38, 1  ;;  %v3207_v63 = vsel %vm421_vm2, %v3050_v25, 0  ;;  %vm289_vm8 = vcmp.lt.s32.totalorder %v3137_v38, 3  ;;  %v300_v11 = vsel %vm290_vm6, %v286_v62, 1326507024 }
 0x10a   :  { %v849_v54 = vmul.f32 -0.001358992, %v848_v24  ;;  %v856_v57 = vmul.f32 -0.00019511016, %v848_v24  ;;  %v974_v26 = vadd.s32 536870912, %v973_v41  ;;  %v295_v43 = vsel %vm287_vm7, %v274_v21, %v3194_v3 }
 0x10b   :  { %v297_v30 = vsel %vm289_vm8, %v280_v17, %v296_v29  ;;  %v1790_v16 = vand.u32 3, %v847_v47  ;;  %v263_v40 = vor.u32 8388608, %v262_v13  ;;  %v299_v25 = vsel %vm287_vm7, %v3194_v3, %v280_v17 }
 0x10c   :  { %v850_v37 = vadd.f32 0.041655596, %v849_v54  ;;  %v857_v7 = vadd.f32 0.008332121, %v856_v57  ;;  %v3215_v31 = vshrl.u32 %v974_v26, 30  ;;  %v301_v49 = vsel %vm289_vm8, %v283_v32, %v300_v11 }
 0x10d   :  { %vm288_vm9 = vcmp.lt.s32.totalorder %v3137_v38, 2  ;;  %v3227_v20 = vand.u32 31, %v3207_v63  ;;  %v864_v12 = vadd.s32 3, %v847_v47  ;;  %vm1792_vm10 = vcmp.eq.s32.totalorder %v1790_v16, 0 }
 0x10e   :  { %v851_v60 = vmul.f32 %v850_v37, %v848_v24  ;;  %v858_v4 = vmul.f32 %v857_v7, %v848_v24  ;;  %v976_v6 = vshll.u32 %v3215_v31, 30  ;;  %v3231_v46 = vsel %vm288_vm9, %v295_v43, %v297_v30 }
 0x10f   :  { %v302_v33 = vsel %vm288_vm9, %v299_v25, %v301_v49  ;;  %vm1795_vm11 = vcmp.eq.s32.totalorder %v1790_v16, 2  ;;  %v271_v14 = vshrl.u32 %v2561_v55, %v3140_v58  ;;  %v3237_v2 = vshll.u32 %v263_v40, 8 }
 0x110   :  { %v852_v9 = vadd.f32 -0.4999988, %v851_v60  ;;  %v859_v51 = vadd.f32 -0.16666654, %v858_v4  ;;  %v977_v39 = vsub.s32 %v973_v41, %v976_v6  ;;  %vm1791_vm13 = vcmp.lt.s32.totalorder %v1790_v16, 2 }
 0x111   :  { %vm863_vm0 = vweird.f32 %v2638_v27  ;;  %v865_v5 = vand.u32 3, %v864_v12  ;;  %v292_v34 = vsel %vm290_vm6, %v280_v17, 2102212464  ;;  %v306_v53 = vand.u32 65535, %v302_v33 }
 0x112   :  { %v853_v56 = vmul.f32 %v852_v9, %v848_v24  ;;  %v860_v42 = vmul.f32 %v859_v51, %v848_v24  ;;  %vm978_vm14 = vcmp.lt.s32.totalorder %v977_v39, 0  ;;  %v979_v45 = vsub.s32 0, %v977_v39 }
 0x113   :  { %v328_v0 = vand.u32 65535, %v3231_v46  ;;  %v307_v58 = vshrl.u32 %v302_v33, 16  ;;  %v969_v41 = vadd.s32 %v3160_v18, %v3145_v23  ;;  %v3247_v47 = vsel %vm287_vm7, %v271_v14, %v274_v21 }
 0x114   :  { %v854_v32 = vadd.f32 1.0, %v853_v56  ;;  %v861_v15 = vadd.f32 1.0, %v860_v42  ;;  %v980_v62 = vsel %vm978_vm14, %v979_v45, %v977_v39  ;;  %v304_v13 = vand.u32 65535, %v3237_v2 }
 0x115   :  { %v981_v24 = vclz %v980_v62  ;;  %v305_v17 = vshrl.u32 %v3237_v2, 16  ;;  %v329_v57 = vshrl.u32 %v3231_v46, 16  ;;  %v999_v43 = vsub.s32 4, %v3215_v31 }
 0x116   :  { %v862_v29 = vmul.f32 %v861_v15, %v846_v61  ;;  %v871_v54 = vxor.u32 2147483648, %v854_v32  ;;  %v293_v23 = vsel %vm289_vm8, %v3194_v3, %v292_v34  ;;  %v330_v18 = vmul.u32 %v328_v0, %v304_v13 }
 0x117   :  { %v2457_v26 = vadd.s32 4294967294, %v981_v24  ;;  %vm866_vm15 = vcmp.lt.s32.totalorder %v865_v5, 2  ;;  %v309_v21 = vmul.u32 %v307_v58, %v304_v13  ;;  %v310_v37 = vmul.u32 %v306_v53, %v305_v17 }
 0x118   :  { %v868_v11 = vxor.u32 2147483648, %v862_v29  ;;  %v1797_v7 = vsel %vm1795_vm11, %v871_v54, %v862_v29  ;;  %vm867_vm2 = vcmp.eq.s32.totalorder %v865_v5, 0  ;;  %v308_v61 = vmul.u32 %v306_v53, %v304_v13 }
 0x119   :  { %vm2458_vm1 = vcmp.lt.s32.totalorder %v2457_v26, 0  ;;  %v312_v25 = vshll.u32 %v309_v21, 16  ;;  %v331_v49 = vmul.u32 %v329_v57, %v304_v13  ;;  %v311_v3 = vmul.u32 %v307_v58, %v305_v17 }
 0x11a   :  { %v1794_v30 = vsel %vm1792_vm10, %v854_v32, %v868_v11  ;;  %v984_v40 = vsel %vm2458_vm1, 0, %v2457_v26  ;;  %v314_v9 = vshll.u32 %v310_v37, 16  ;;  %vm870_vm5 = vcmp.eq.s32.totalorder %v865_v5, 2 }
 0x11b   :  { %v1798_v60 = vsel %vm1791_vm13, %v1794_v30, %v1797_v7  ;;  %v985_v4 = vsub.s32 32, %v984_v40  ;;  %v989_v6 = vsub.s32 4294967266, %v984_v40  ;;  %v986_v46 = vshll.u32 %v977_v39, %v984_v40  ;;  %v3265_v39 = vld [vmem:[%s3591_s2] sm:$0xff] }
 0x11c   :  { %v1799_v12 = vsel %vm863_vm0, nan, %v1798_v60  ;;  %vm316_vm4 = vc.u32 %v308_v61, %v312_v25  ;;  %v318_v56 = vadd.s32 %v312_v25, %v308_v61  ;;  %v332_v45 = vmul.u32 %v328_v0, %v305_v17  ;;  %2489 = vmatmul.msk.f32.vlgmr.msra.gmra.mxu3 %vm1962_vm12, %v3265_v39 }
 0x11d   :  { %2018 = vmatpush.msrb.mxu1 %v1799_v12  ;;  %v987_v51 = vshrl.u32 %v969_v41, %v985_v4  ;;  %v990_v33 = vadd.s32 127, %v989_v6  ;;  %v317_v14 = vsel %vm316_vm4, 1, %v2557_v1  ;;  %v334_v16 = vshll.u32 %v331_v49, 16 }
 0x11e   :  { %v319_v42 = vadd.s32 %v317_v14, %v311_v3  ;;  %v313_v15 = vshrl.u32 %v309_v21, 16  ;;  %vm320_vm3 = vc.u32 %v318_v56, %v314_v9  ;;  %v869_v62 = vsel %vm867_vm2, %v854_v32, %v868_v11 }
 0x11f   :  { %v988_v34 = vor.u32 %v987_v51, %v986_v46  ;;  %v991_v53 = vshll.u32 %v990_v33, 23  ;;  %v872_v58 = vsel %vm870_vm5, %v871_v54, %v862_v29  ;;  %v315_v41 = vshrl.u32 %v310_v37, 16 }
 0x120   :  { %v321_v24 = vsel %vm320_vm3, 1, %v2557_v1  ;;  %v873_v0 = vsel %vm866_vm15, %v869_v62, %v872_v58  ;;  %v333_v21 = vmul.u32 %v329_v57, %v305_v17  ;;  %v336_v61 = vshll.u32 %v332_v45, 16 }
 0x121   :  { %v992_v13 = vor.u32 4788187, %v991_v53  ;;  %v323_v26 = vadd.s32 %v321_v24, %v319_v42  ;;  %v874_v7 = vsel %vm863_vm0, nan, %v873_v0  ;;  %vm338_vm6 = vc.u32 %v330_v18, %v334_v16 }
 0x122   :  { %v340_v30 = vadd.s32 %v334_v16, %v330_v18  ;;  %v995_v32 = vcvt.s32.f32 %v988_v34  ;;  %2117 = vmatpush.msrb.mxu0 %v874_v7  ;;  %v339_v54 = vsel %vm338_vm6, 1, %v2557_v1  ;;  %v3276_v11 = vsub.s32 32, %v3227_v20 }
 0x123   :  { %v993_v40 = vand.u32 2147483647, %v992_v13  ;;  %v324_v29 = vadd.s32 %v323_v26, %v313_v15  ;;  %v341_v37 = vadd.s32 %v339_v54, %v333_v21  ;;  %v410_v5 = vand.u32 2147483647, %v2647_v36 }
 0x124   :  { %vm342_vm7 = vc.u32 %v340_v30, %v336_v61  ;;  %v294_v27 = vsel %vm288_vm9, %v3247_v47, %v293_v23  ;;  %v3286_v25 = vshrl.u32 %v3207_v63, 5  ;;  %vm877_vm8 = vcmp.lt.s32.totalorder %v2640_v28, 0 }
 0x125   :  { %v996_v17 = vmul.f32 %v995_v32, %v993_v40  ;;  %v3282_v57 = vadd.s32 %v324_v29, %v315_v41  ;;  %v343_v18 = vsel %vm342_vm7, 1, %v2557_v1  ;;  %v335_v60 = vshrl.u32 %v331_v49, 16 }
 0x126   :  { %v345_v4 = vadd.s32 %v343_v18, %v341_v37  ;;  %vm3291_vm10 = vcmp.le.f32.partialorder %v875_v44, 0.7853982  ;;  %v1000_v38 = vsel %vm877_vm8, %v999_v43, %v3215_v31  ;;  %v3298_v47 = vadd.s32 %v340_v30, %v336_v61 }
 0x127   :  { %v997_v3 = vxor.u32 2147483648, %v996_v17  ;;  %v337_v23 = vshrl.u32 %v332_v45, 16  ;;  %v348_v12 = vmul.u32 %v3237_v2, %v294_v27  ;;  %v417_v49 = vand.u32 8388607, %v410_v5 }
 0x128   :  { %v346_v63 = vadd.s32 %v345_v4, %v335_v60  ;;  %vm350_vm9 = vc.u32 %v3282_v57, %v3298_v47  ;;  %v427_v44 = vshll.u32 %v2561_v55, %v3227_v20  ;;  %v428_v9 = vshrl.u32 %v2558_v48, %v3276_v11 }
 0x129   :  { %v998_v46 = vsel %vm877_vm8, %v997_v3, %v996_v17  ;;  %v431_v2 = vshrl.u32 %v2559_v50, %v3276_v11  ;;  %v434_v51 = vshrl.u32 %v2560_v52, %v3276_v11  ;;  %v430_v14 = vshll.u32 %v2558_v48, %v3227_v20 }
 0x12a   :  { %v1001_v31 = vsel %vm3291_vm10, %v2640_v28, %v998_v46  ;;  %v347_v43 = vadd.s32 %v346_v63, %v337_v23  ;;  %v436_v56 = vshll.u32 %v2560_v52, %v3227_v20  ;;  %v437_v42 = vshrl.u32 %v2562_v59, %v3276_v11 }
 0x12b   :  { %v1003_v33 = vmul.f32 %v1001_v31, %v1001_v31  ;;  %v433_v16 = vshll.u32 %v2559_v50, %v3227_v20  ;;  %v439_v34 = vshll.u32 %v2562_v59, %v3227_v20  ;;  %v440_v53 = vshrl.u32 %v2563_v8, %v3276_v11 }
 0x12c   :  { %v351_v45 = vadd.s32 1, %v347_v43  ;;  %v3328_v58 = vor.u32 %v428_v9, %v427_v44  ;;  %v438_v48 = vor.u32 %v437_v42, %v436_v56  ;;  %v3333_v41 = vor.u32 %v431_v2, %v430_v14 }
 0x12d   :  { %v1004_v15 = vmul.f32 -0.001358992, %v1003_v33  ;;  %v1011_v62 = vmul.f32 -0.00019511016, %v1003_v33  ;;  %v3335_v24 = vor.u32 %v434_v51, %v433_v16  ;;  %v441_v50 = vor.u32 %v440_v53, %v439_v34 }
 0x12e   :  { %v352_v52 = vsel %vm350_vm9, %v351_v45, %v347_v43  ;;  %vm445_vm11 = vcmp.lt.s32.totalorder %v3286_v25, 4  ;;  %v418_v8 = vor.u32 8388608, %v417_v49  ;;  %vm442_vm13 = vcmp.lt.s32.totalorder %v3286_v25, 1 }
 0x12f   :  { %v1005_v13 = vadd.f32 0.041655596, %v1004_v15  ;;  %v1012_v0 = vadd.f32 0.008332121, %v1011_v62  ;;  %v353_v59 = vadd.s32 %v352_v52, %v348_v12  ;;  %v451_v20 = vsel %vm445_vm11, %v438_v48, 920167782 }
 0x130   :  { %vm444_vm14 = vcmp.lt.s32.totalorder %v3286_v25, 3  ;;  %v3344_v61 = vsel %vm3291_vm10, 0, %v1000_v38  ;;  %v450_v30 = vsel %vm442_vm13, %v3328_v58, %v3333_v41  ;;  %v455_v32 = vsel %vm445_vm11, %v441_v50, 1326507024 }
 0x131   :  { %v1006_v26 = vmul.f32 %v1005_v13, %v1003_v33  ;;  %v1013_v21 = vmul.f32 %v1012_v0, %v1003_v33  ;;  %v354_v7 = vadd.s32 536870912, %v353_v59  ;;  %v452_v40 = vsel %vm444_vm14, %v3335_v24, %v451_v20 }
 0x132   :  { %v454_v17 = vsel %vm442_vm13, %v3333_v41, %v3335_v24  ;;  %vm443_vm0 = vcmp.lt.s32.totalorder %v3286_v25, 2  ;;  %v456_v27 = vsel %vm444_vm14, %v438_v48, %v455_v32  ;;  %v3364_v18 = vshll.u32 %v418_v8, 8 }
 0x133   :  { %v1007_v29 = vadd.f32 -0.4999988, %v1006_v26  ;;  %v1014_v54 = vadd.f32 -0.16666654, %v1013_v21  ;;  %v3355_v37 = vshrl.u32 %v354_v7, 30  ;;  %v453_v3 = vsel %vm443_vm0, %v450_v30, %v452_v40 }
 0x134   :  { %v1944_v38 = vand.u32 3, %v3344_v61  ;;  %v457_v23 = vsel %vm443_vm0, %v454_v17, %v456_v27  ;;  %v459_v46 = vand.u32 65535, %v3364_v18  ;;  %v484_v43 = vshrl.u32 %v453_v3, 16 }
 0x135   :  { %v1008_v60 = vmul.f32 %v1007_v29, %v1003_v33  ;;  %v1015_v4 = vmul.f32 %v1014_v54, %v1003_v33  ;;  %v356_v6 = vshll.u32 %v3355_v37, 30  ;;  %v461_v44 = vand.u32 65535, %v457_v23 }
 0x136   :  { %v462_v9 = vshrl.u32 %v457_v23, 16  ;;  %vm1945_vm1 = vcmp.lt.s32.totalorder %v1944_v38, 2  ;;  %v460_v45 = vshrl.u32 %v3364_v18, 16  ;;  %v483_v16 = vand.u32 65535, %v453_v3 }
 0x137   :  { %v3372_v63 = vadd.f32 1.0, %v1008_v60  ;;  %v1016_v12 = vadd.f32 1.0, %v1015_v4  ;;  %v357_v49 = vsub.s32 %v353_v59, %v356_v6  ;;  %vm1946_vm2 = vcmp.eq.s32.totalorder %v1944_v38, 0 }
 0x138   :  { %v464_v14 = vmul.u32 %v462_v9, %v459_v46  ;;  %vm1949_vm4 = vcmp.eq.s32.totalorder %v1944_v38, 2  ;;  %v486_v53 = vmul.u32 %v484_v43, %v459_v46  ;;  %v465_v62 = vmul.u32 %v461_v44, %v460_v45 }
 0x139   :  { %v3375_v2 = vmul.f32 %v1016_v12, %v1001_v31  ;;  %v1026_v51 = vxor.u32 2147483648, %v3372_v63  ;;  %vm358_vm15 = vcmp.lt.s32.totalorder %v357_v49, 0  ;;  %v359_v33 = vsub.s32 0, %v357_v49 }
 0x13a   :  { %v467_v48 = vshll.u32 %v464_v14, 16  ;;  %vm1018_vm5 = vweird.f32 %v2640_v28  ;;  %v463_v13 = vmul.u32 %v461_v44, %v459_v46  ;;  %v349_v59 = vadd.s32 %v3298_v47, %v3282_v57  ;;  %v3451_v28 = vld [vmem:[%s3592_s3 + $0x8] sm:$0xff] }
 0x13b   :  { %v1023_v56 = vxor.u32 2147483648, %v3375_v2  ;;  %v360_v42 = vsel %vm358_vm15, %v359_v33, %v357_v49  ;;  %v1951_v15 = vsel %vm1949_vm4, %v1026_v51, %v3375_v2  ;;  %v485_v8 = vmul.u32 %v483_v16, %v459_v46  ;;  %2478 = vmatmul.msk.f32.gmra.mxu0 %vm1962_vm12, %v3451_v28 }
 0x13c   :  { %v361_v34 = vclz %v360_v42  ;;  %v487_v20 = vmul.u32 %v483_v16, %v460_v45  ;;  %v466_v26 = vmul.u32 %v462_v9, %v460_v45  ;;  %vm471_vm6 = vc.u32 %v463_v13, %v467_v48 }
 0x13d   :  { %v1948_v31 = vsel %vm1946_vm2, %v3372_v63, %v1023_v56  ;;  %v473_v21 = vadd.s32 %v467_v48, %v463_v13  ;;  %v469_v30 = vshll.u32 %v465_v62, 16  ;;  %v472_v40 = vsel %vm471_vm6, 1, %v2557_v1 }
 0x13e   :  { %v1952_v52 = vsel %vm1945_vm1, %v1948_v31, %v1951_v15  ;;  %v2445_v50 = vadd.s32 4294967294, %v361_v34  ;;  %v489_v32 = vshll.u32 %v486_v53, 16  ;;  %v468_v17 = vshrl.u32 %v464_v14, 16 }
 0x13f   :  { %v1953_v0 = vsel %vm1018_vm5, nan, %v1952_v52  ;;  %v474_v27 = vadd.s32 %v472_v40, %v466_v26  ;;  %vm475_vm7 = vc.u32 %v473_v21, %v469_v30  ;;  %v488_v4 = vmul.u32 %v484_v43, %v460_v45 }
 0x140   :  { %2047 = vmatpush.msrb.mxu2 %v1953_v0  ;;  %vm2446_vm3 = vcmp.lt.s32.totalorder %v2445_v50, 0  ;;  %vm493_vm8 = vc.u32 %v485_v8, %v489_v32  ;;  %v476_v6 = vsel %vm475_vm7, 1, %v2557_v1  ;;  %v491_v23 = vshll.u32 %v487_v20, 16 }
 0x141   :  { %v364_v7 = vsel %vm2446_vm3, 0, %v2445_v50  ;;  %v494_v3 = vsel %vm493_vm8, 1, %v2557_v1  ;;  %v478_v38 = vadd.s32 %v476_v6, %v474_v27  ;;  %v495_v12 = vadd.s32 %v489_v32, %v485_v8 }
 0x142   :  { %v365_v29 = vsub.s32 32, %v364_v7  ;;  %v369_v54 = vsub.s32 4294967266, %v364_v7  ;;  %v366_v60 = vshll.u32 %v357_v49, %v364_v7  ;;  %v496_v46 = vadd.s32 %v494_v3, %v488_v4 }
 0x143   :  { %v426_v33 = vshrl.u32 %v2561_v55, %v3276_v11  ;;  %v447_v49 = vsel %vm445_vm11, %v3335_v24, 2102212464  ;;  %v479_v43 = vadd.s32 %v478_v38, %v468_v17  ;;  %vm497_vm10 = vc.u32 %v495_v12, %v491_v23 }
 0x144   :  { %v367_v57 = vshrl.u32 %v349_v59, %v365_v29  ;;  %v370_v47 = vadd.s32 127, %v369_v54  ;;  %v470_v42 = vshrl.u32 %v465_v62, 16  ;;  %v498_v45 = vsel %vm497_vm10, 1, %v2557_v1 }
 0x145   :  { %v446_v16 = vsel %vm442_vm13, %v426_v33, %v3328_v58  ;;  %v490_v34 = vshrl.u32 %v486_v53, 16  ;;  %v500_v31 = vadd.s32 %v498_v45, %v496_v46  ;;  %v448_v55 = vsel %vm444_vm14, %v3333_v41, %v447_v49  ;;  %v3456_v41 = vld [vmem:[%s3591_s2 + $0x8] sm:$0xff] }
 0x146   :  { %v368_v44 = vor.u32 %v367_v57, %v366_v60  ;;  %v371_v9 = vshll.u32 %v370_v47, 23  ;;  %v3406_v11 = vadd.s32 %v479_v43, %v470_v42  ;;  %v492_v24 = vshrl.u32 %v487_v20, 16  ;;  %2490 = vmatmul.msk.f32.gmra.mxu3 %vm1962_vm12, %v3456_v41 }
 0x147   :  { %v501_v52 = vadd.s32 %v500_v31, %v490_v34  ;;  %v499_v62 = vadd.s32 %v495_v12, %v491_v23  ;;  %v449_v1 = vsel %vm443_vm0, %v446_v16, %v448_v55  ;;  %vm257_vm11 = vcmp.lt.s32.totalorder %v2645_v35, 0 }
 0x148   :  { %v372_v14 = vor.u32 4788187, %v371_v9  ;;  %v375_v48 = vcvt.s32.f32 %v368_v44  ;;  %vm3414_vm13 = vcmp.le.f32.partialorder %v255_v22, 0.7853982  ;;  %v503_v59 = vmul.u32 %v3364_v18, %v449_v1 }
 0x149   :  { %v502_v13 = vadd.s32 %v501_v52, %v492_v24  ;;  %vm505_vm9 = vc.u32 %v3406_v11, %v499_v62  ;;  %v379_v21 = vsub.s32 4, %v3355_v37  ;;  %v1019_v54 = vadd.s32 3, %v3344_v61 }
 0x14a   :  { %v373_v15 = vand.u32 2147483647, %v372_v14  ;;  %vm398_vm2 = vweird.f32 %v2645_v35 }
 0x14b   :  { %v506_v58 = vadd.s32 1, %v502_v13  ;;  %v380_v18 = vsel %vm257_vm11, %v379_v21, %v3355_v37  ;;  %v1020_v6 = vand.u32 3, %v1019_v54  ;;  %v2162_v54 = vld [vmem:[%s3593_s4 + $0x8] sm:$0xff] }
 0x14c   :  { %v376_v50 = vmul.f32 %v375_v48, %v373_v15  ;;  %v382_v3 = vsel %vm3414_vm13, 0, %v380_v18  ;;  %v504_v15 = vadd.s32 %v499_v62, %v3406_v11  ;;  %2172 = vperm.xlu2 %2530, %v2162_v54  }
 0x14d   :  { %v507_v8 = vsel %vm505_vm9, %v506_v58, %v502_v13  ;;  %v1328_v44 = vand.u32 3, %v382_v3  ;;  %vm1022_vm0 = vcmp.eq.s32.totalorder %v1020_v6, 0  ;;  %vm1021_vm15 = vcmp.lt.s32.totalorder %v1020_v6, 2 }
 0x14e   :  { %v377_v0 = vxor.u32 2147483648, %v376_v50  ;;  %v508_v26 = vadd.s32 %v507_v8, %v503_v59  ;;  %v1024_v33 = vsel %vm1022_vm0, %v3372_v63, %v1023_v56  ;;  %vm1025_vm1 = vcmp.eq.s32.totalorder %v1020_v6, 2  ;;  %v2164_v8 = vld [vmem:[%s3593_s4 + $0x18] sm:$0xff] }
 0x14f   :  { %v399_v42 = vadd.s32 3, %v382_v3  ;;  %v1027_v45 = vsel %vm1025_vm1, %v1026_v51, %v3375_v2  ;;  %vm1329_vm4 = vcmp.lt.s32.totalorder %v1328_v44, 2  ;;  %vm1330_vm3 = vcmp.eq.s32.totalorder %v1328_v44, 0  ;;  %2182 = vperm.xlu1 %2529, %v2164_v8  }
 0x150   :  { %v378_v53 = vsel %vm257_vm11, %v377_v0, %v376_v50  ;;  %v509_v22 = vadd.s32 536870912, %v508_v26  ;;  %v1028_v34 = vsel %vm1021_vm15, %v1024_v33, %v1027_v45  ;;  %vm1333_vm6 = vcmp.eq.s32.totalorder %v1328_v44, 2 }
 0x151   :  { %v381_v25 = vsel %vm3414_vm13, %v2645_v35, %v378_v53  ;;  %v400_v50 = vand.u32 3, %v399_v42  ;;  %v1029_v2 = vsel %vm1018_vm5, nan, %v1028_v34  ;;  %v2163_v35 = vld [vmem:[%s3593_s4 + $0x10] sm:$0xff]  ;;  %vm412_vm5 = vcmp.lt.s32.totalorder %v2647_v36, 0  ;;  %v2214_v34 = vld [vmem:[%s3595_s6 + $0x8] sm:$0xff] }
 0x152   :  { %v383_v20 = vmul.f32 %v381_v25, %v381_v25  ;;  %v3425_v29 = vshrl.u32 %v509_v22, 30  ;;  %vm3487_vm11 = vcmp.le.f32.partialorder %v410_v5, 0.7853982 }
 0x153   :  { %vm402_vm8 = vcmp.eq.s32.totalorder %v400_v50, 0  ;;  %vm405_vm10 = vcmp.eq.s32.totalorder %v400_v50, 2  ;;  %vm401_vm9 = vcmp.lt.s32.totalorder %v400_v50, 2 }
 0x154   :  { %v384_v7 = vmul.f32 -0.001358992, %v383_v20  ;;  %v391_v30 = vmul.f32 -0.00019511016, %v383_v20  ;;  %v511_v60 = vshll.u32 %v3425_v29, 30  ;;  %v534_v18 = vsub.s32 4, %v3425_v29 }
 0x156   :  { %v385_v40 = vadd.f32 0.041655596, %v384_v7  ;;  %v392_v32 = vadd.f32 0.008332121, %v391_v30  ;;  %v512_v47 = vsub.s32 %v508_v26, %v511_v60  ;;  %v3477_v30 = vld [vmem:[%s3591_s2 + $0x10] sm:$0xff] }
 0x157   :  { %2491 = vmatmul.msk.f32.gmra.mxu3 %vm1962_vm12, %v3477_v30  ;;  %2177 = vperm.xlu1 %2529, %v2163_v35  }
 0x158   :  { %v386_v17 = vmul.f32 %v385_v40, %v383_v20  ;;  %v393_v27 = vmul.f32 %v392_v32, %v383_v20  ;;  %vm513_vm14 = vcmp.lt.s32.totalorder %v512_v47, 0  ;;  %v514_v12 = vsub.s32 0, %v512_v47 }
 0x15a   :  { %v387_v4 = vadd.f32 -0.4999988, %v386_v17  ;;  %v394_v57 = vadd.f32 -0.16666654, %v393_v27  ;;  %v515_v9 = vsel %vm513_vm14, %v514_v12, %v512_v47  ;;  %v2215_v12 = vld [vmem:[%s3595_s6 + $0x10] sm:$0xff] }
 0x15b   :  { %v516_v37 = vclz %v515_v9 }
 0x15c   :  { %v388_v38 = vmul.f32 %v387_v4, %v383_v20  ;;  %v395_v23 = vmul.f32 %v394_v57, %v383_v20  ;;  %v535_v4 = vsel %vm412_vm5, %v534_v18, %v3425_v29  ;;  %v1957_v57 = vld [vmem:[%s3591_s2 + $0x18] sm:$0xff]  ;;  %v2161_v29 = vld [vmem:[%s3593_s4] sm:$0xff] }
 0x15d   :  { %v2448_v14 = vadd.s32 4294967294, %v516_v37  ;;  %v537_v3 = vsel %vm3487_vm11, 0, %v535_v4  ;;  %2167 = vperm.xlu2 %2530, %v2161_v29  }
 0x15e   :  { %v389_v61 = vadd.f32 1.0, %v388_v38  ;;  %v396_v46 = vadd.f32 1.0, %v395_v23  ;;  %v554_v44 = vadd.s32 3, %v537_v3 }
 0x15f   :  { %vm2449_vm7 = vcmp.lt.s32.totalorder %v2448_v14, 0  ;;  %2492 = vmatmul.msk.f32.gmra.mxu3 %vm1962_vm12, %v1957_v57  ;;  %2229 = vperm.xlu1 %2529, %v2215_v12  }
 0x160   :  { %v397_v49 = vmul.f32 %v396_v46, %v381_v25  ;;  %v406_v43 = vxor.u32 2147483648, %v389_v61  ;;  %v519_v48 = vsel %vm2449_vm7, 0, %v2448_v14  ;;  %v3465_v25 = vld [vmem:[%s3592_s3 + $0x18] sm:$0xff]  ;;  %v555_v14 = vand.u32 3, %v554_v44 }
 0x161   :  { %v520_v24 = vsub.s32 32, %v519_v48  ;;  %v524_v52 = vsub.s32 4294967266, %v519_v48  ;;  %v521_v51 = vshll.u32 %v512_v47, %v519_v48  ;;  %2480 = vmatmul.msk.f32.vlgmr.msra.gmra.mxu2 %vm1962_vm12, %v3465_v25 }
 0x162   :  { %v403_v16 = vxor.u32 2147483648, %v397_v49  ;;  %v1335_v56 = vsel %vm1333_vm6, %v406_v43, %v397_v49  ;;  %v407_v62 = vsel %vm405_vm10, %v406_v43, %v397_v49  ;;  %v1482_v43 = vand.u32 3, %v537_v3 }
 0x163   :  { %v522_v1 = vshrl.u32 %v504_v15, %v520_v24  ;;  %v525_v13 = vadd.s32 127, %v524_v52  ;;  %vm556_vm15 = vcmp.lt.s32.totalorder %v555_v14, 2  ;;  %vm557_vm1 = vcmp.eq.s32.totalorder %v555_v14, 0 }
 0x164   :  { %v1332_v31 = vsel %vm1330_vm3, %v389_v61, %v403_v16  ;;  %v404_v11 = vsel %vm402_vm8, %v389_v61, %v403_v16  ;;  %v2350_v16 = vld [vmem:[%s3597_s8] sm:$0xff]  ;;  %vm1483_vm13 = vcmp.lt.s32.totalorder %v1482_v43, 2  ;;  %vm1484_vm14 = vcmp.eq.s32.totalorder %v1482_v43, 0 }
 0x165   :  { %v1336_v55 = vsel %vm1329_vm4, %v1332_v31, %v1335_v56  ;;  %v523_v0 = vor.u32 %v522_v1, %v521_v51  ;;  %v526_v58 = vshll.u32 %v525_v13, 23  ;;  %v408_v59 = vsel %vm401_vm9, %v404_v11, %v407_v62  ;;  %2224 = vperm.xlu2 %2530, %v2214_v34  }
 0x166   :  { %v1337_v63 = vsel %vm398_vm2, nan, %v1336_v55  ;;  %v409_v20 = vsel %vm398_vm2, nan, %v408_v59  ;;  %vm1487_vm0 = vcmp.eq.s32.totalorder %v1482_v43, 2  ;;  %vm560_vm2 = vcmp.eq.s32.totalorder %v555_v14, 2  ;;  %v2211_v14 = vld [vmem:[%s3594_s5 + $0x10] sm:$0xff] }
 0x167   :  { %2019 = vmatpush.msrb.mxu1 %v1337_v63  ;;  %v527_v53 = vor.u32 4788187, %v526_v58  ;;  %v530_v21 = vcvt.s32.f32 %v523_v0  ;;  %2118 = vmatpush.msrb.mxu0 %v409_v20  ;;  %vm553_vm4 = vweird.f32 %v2647_v36 }
 0x168   :  { %2481 = vmatmul.msk.f32.vlgmr.msrb.gmra.mxu1 %vm1962_vm12, %v3115_v10  ;;  %2493 = vmatmul.msk.f32.vlgmr.msrb.gmra.mxu0 %vm1962_vm12, %v3265_v39 }
 0x169   :  { %2146 = vmatpush.msra.mxu1 %v1029_v2  ;;  %v528_v26 = vand.u32 2147483647, %v527_v53  ;;  %2353 = vperm.xlu1 %2529, %v2350_v16   ;;  %v2212_v16 = vld [vmem:[%s3594_s5 + $0x18] sm:$0xff] }
 0x16b   :  { %v531_v7 = vmul.f32 %v530_v21, %v528_v26 }
 0x16d   :  { %v532_v22 = vxor.u32 2147483648, %v531_v7 }
 0x16f   :  { %v533_v32 = vsel %vm412_vm5, %v532_v22, %v531_v7 }
 0x170   :  { %2482 = vmatmul.msk.f32.gmra.mxu1 %vm1962_vm12, %v3451_v28  ;;  %v536_v5 = vsel %vm3487_vm11, %v2647_v36, %v533_v32  ;;  %2494 = vmatmul.msk.f32.gmra.mxu0 %vm1962_vm12, %v3456_v41 }
 0x171   :  { %v538_v17 = vmul.f32 %v536_v5, %v536_v5 }
 0x173   :  { %v539_v27 = vmul.f32 -0.001358992, %v538_v17  ;;  %v546_v60 = vmul.f32 -0.00019511016, %v538_v17 }
 0x175   :  { %v540_v47 = vadd.f32 0.041655596, %v539_v27  ;;  %v547_v6 = vadd.f32 0.008332121, %v546_v60 }
 0x176   :  { %v1998_v36 = vpop.f32.mrf.mxu1 }
 0x177   :  { %v541_v38 = vmul.f32 %v540_v47, %v538_v17  ;;  %v548_v23 = vmul.f32 %v547_v6, %v538_v17  ;;  %v2209_v6 = vld [vmem:[%s3594_s5] sm:$0xff] }
 0x178   :  { %2483 = vmatmul.msk.f32.gmra.mxu1 %vm1962_vm12, %v3120_v19  ;;  %2495 = vmatmul.msk.f32.gmra.mxu0 %vm1962_vm12, %v3477_v30 }
 0x179   :  { %v542_v61 = vadd.f32 -0.4999988, %v541_v38  ;;  %v549_v46 = vadd.f32 -0.16666654, %v548_v23 }
 0x17b   :  { %v543_v9 = vmul.f32 %v542_v61, %v538_v17  ;;  %v550_v37 = vmul.f32 %v549_v46, %v538_v17 }
 0x17d   :  { %v544_v33 = vadd.f32 1.0, %v543_v9  ;;  %v551_v49 = vadd.f32 1.0, %v550_v37 }
 0x17f   :  { %v552_v42 = vmul.f32 %v551_v49, %v536_v5  ;;  %v561_v45 = vxor.u32 2147483648, %v544_v33 }
 0x180   :  { %2484 = vmatmul.msk.f32.gmra.mxu1 %vm1962_vm12, %v3465_v25  ;;  %2496 = vmatmul.msk.f32.gmra.mxu0 %vm1962_vm12, %v1957_v57 }
 0x181   :  { %v558_v31 = vxor.u32 2147483648, %v552_v42  ;;  %v1489_v15 = vsel %vm1487_vm0, %v561_v45, %v552_v42  ;;  %v562_v55 = vsel %vm560_vm2, %v561_v45, %v552_v42 }
 0x183   :  { %v1486_v56 = vsel %vm1484_vm14, %v544_v33, %v558_v31  ;;  %v559_v48 = vsel %vm557_vm1, %v544_v33, %v558_v31  ;;  %v2210_v33 = vld [vmem:[%s3594_s5 + $0x8] sm:$0xff] }
 0x184   :  { %v1490_v24 = vsel %vm1483_vm13, %v1486_v56, %v1489_v15  ;;  %v563_v52 = vsel %vm556_vm15, %v559_v48, %v562_v55 }
 0x185   :  { %v1491_v50 = vsel %vm553_vm4, nan, %v1490_v24  ;;  %v564_v63 = vsel %vm553_vm4, nan, %v563_v52 }
 0x186   :  { %2048 = vmatpush.msrb.mxu2 %v1491_v50  ;;  %2147 = vmatpush.msra.mxu1 %v564_v63 }
 0x187   :  { %2485 = vmatmul.msk.f32.vlgmr.msrb.gmra.mxu2 %vm1962_vm12, %v3115_v10  ;;  %v1992_v10 = vpop.f32.mrf.mxu0 }
 0x188   :  { %2497 = vmatmul.msk.f32.vlgmr.msra.gmra.mxu1 %vm1962_vm12, %v3265_v39 }
 0x18f   :  { %2486 = vmatmul.msk.f32.gmra.mxu2 %vm1962_vm12, %v3451_v28 }
 0x190   :  { %2498 = vmatmul.msk.f32.gmra.mxu1 %vm1962_vm12, %v3456_v41 }
 0x197   :  { %2487 = vmatmul.msk.f32.gmra.mxu2 %vm1962_vm12, %v3120_v19 }
 0x198   :  { %2499 = vmatmul.msk.f32.gmra.mxu1 %vm1962_vm12, %v3477_v30 }
 0x19f   :  { %2488 = vmatmul.msk.f32.gmra.mxu2 %vm1962_vm12, %v3465_v25  ;;  %v2091_v39 = vpop.f32.mrf.mxu3 }
 0x1a0   :  { %2500 = vmatmul.msk.f32.gmra.mxu1 %vm1962_vm12, %v1957_v57  ;;  %v2092_v7 = vadd.f32 %v2091_v39, %v1992_v10  ;;  %vm2237_vm12 = vcmask 261120  }
 0x1a6   :  { %v3548_v28 = vpop.permute.xlu2 %2172 }
 0x1b7   :  { %v2168_v32 = vpop.permute.xlu2 %2167 }
 0x1b8   :  { %v1995_v51 = vpop.f32.mrf.mxu0  ;;  %v2185_v54 = vadd.f32 %v2168_v32, %v2092_v7 }
 0x1ba   :  { %v2197_v47 = vmax.f32 %v2185_v54, 0.0 }
 0x1c1   :  { %v3546_v58 = vpop.permute.xlu1 %2182 }
 0x1c9   :  { %v2094_v1 = vpop.f32.mrf.mxu3  ;;  %v2178_v59 = vpop.permute.xlu1 %2177 }
 0x1ca   :  { %v2095_v8 = vadd.f32 %v2094_v1, %v1995_v51 }
 0x1cc   :  { %v2188_v35 = vadd.f32 %v3548_v28, %v2095_v8 }
 0x1ce   :  { %v2200_v5 = vmax.f32 %v2188_v35, 0.0 }
 0x1da   :  { %v2097_v11 = vpop.f32.mrf.mxu3 }
 0x1db   :  { %v2098_v53 = vadd.f32 %v2097_v11, %v1998_v36 }
 0x1dd   :  { %v2191_v30 = vadd.f32 %v2178_v59, %v2098_v53  ;;  %v2225_v53 = vpop.permute.xlu2 %2224 }
 0x1df   :  { %v2203_v18 = vmax.f32 %v2191_v30, 0.0 }
 0x1e2   :  { %v2100_v25 = vpop.f32.mrf.mxu3 }
 0x1e4   :  { %v2001_v41 = vpop.f32.mrf.mxu2 }
 0x1e5   :  { %v2021_v2 = vpop.f32.mrf.mxu1  ;;  %v2120_v0 = vpop.f32.mrf.mxu0  ;;  %v2101_v20 = vadd.f32 %v2100_v25, %v2001_v41 }
 0x1e6   :  { %v2121_v3 = vadd.f32 %v2120_v0, %v2021_v2 }
 0x1e7   :  { %v2194_v22 = vadd.f32 %v3546_v58, %v2101_v20 }
 0x1e8   :  { %v2186_v44 = vadd.f32 %v2168_v32, %v2121_v3 }
 0x1e9   :  { %v2206_v40 = vmax.f32 %v2194_v22, 0.0  ;;  %v2349_v22 = vld [vmem:[%s3596_s7] sm:$0xff]  ;;  %s2564_s7 = smov [#allocation2]  }
 0x1ea   :  { %v2198_v49 = vmax.f32 %v2186_v44, 0.0  ;;  %s2430_s30 = sshll.u32 %s2564_s7, 4  ;;  %s2431_s30 = int_to_ptr.vmem [resolvable:$true] %s2430_s30 }
 0x1eb   :  { %2262 = vmatpush.msra.mxu2 %v2206_v40 }
 0x1ed   :  { %v2024_v13 = vpop.f32.mrf.mxu1  ;;  %v2123_v62 = vpop.f32.mrf.mxu0  ;;  %2263 = vmatpush.msra.mxu2 %v2203_v18 }
 0x1ee   :  { %v2124_v60 = vadd.f32 %v2123_v62, %v2024_v13 }
 0x1ef   :  { %2264 = vmatpush.msra.mxu2 %v2200_v5 }
 0x1f0   :  { %v2189_v12 = vadd.f32 %v3548_v28, %v2124_v60 }
 0x1f1   :  { %2265 = vmatpush.msra.mxu2 %v2197_v47 }
 0x1f2   :  { %2501 = vmatmul.msk.f32.vlgmr.msra.gmra.mxu2 %vm2237_vm12, %v2209_v6  ;;  %v2201_v37 = vmax.f32 %v2189_v12, 0.0 }
 0x1f5   :  { %v2027_v19 = vpop.f32.mrf.mxu1  ;;  %v2126_v21 = vpop.f32.mrf.mxu0 }
 0x1f6   :  { %v2127_v17 = vadd.f32 %v2126_v21, %v2027_v19  ;;  %v2230_v19 = vpop.permute.xlu1 %2229 }
 0x1f8   :  { %v2192_v23 = vadd.f32 %v2178_v59, %v2127_v17 }
 0x1fa   :  { %v2204_v46 = vmax.f32 %v2192_v23, 0.0  ;;  %2502 = vmatmul.msk.f32.gmra.mxu2 %vm2237_vm12, %v2210_v33 }
 0x1fd   :  { %v2030_v26 = vpop.f32.mrf.mxu1  ;;  %v2129_v27 = vpop.f32.mrf.mxu0 }
 0x1fe   :  { %v2130_v4 = vadd.f32 %v2129_v27, %v2030_v26 }
 0x200   :  { %v2195_v38 = vadd.f32 %v3546_v58, %v2130_v4 }
 0x202   :  { %v2207_v29 = vmax.f32 %v2195_v38, 0.0  ;;  %2503 = vmatmul.msk.f32.gmra.mxu2 %vm2237_vm12, %v2211_v14 }
 0x204   :  { %2291 = vmatpush.msrb.mxu3 %v2207_v29 }
 0x205   :  { %v2149_v57 = vpop.f32.mrf.mxu1 }
 0x206   :  { %2292 = vmatpush.msrb.mxu3 %v2204_v46 }
 0x208   :  { %2293 = vmatpush.msrb.mxu3 %v2201_v37 }
 0x20a   :  { %v2050_v61 = vpop.f32.mrf.mxu2  ;;  %2294 = vmatpush.msrb.mxu3 %v2198_v49  ;;  %2504 = vmatmul.msk.f32.gmra.mxu2 %vm2237_vm12, %v2212_v16 }
 0x20b   :  { %2505 = vmatmul.msk.f32.vlgmr.msrb.gmra.mxu3 %vm2237_vm12, %v2209_v6  ;;  %v2150_v55 = vadd.f32 %v2149_v57, %v2050_v61 }
 0x20d   :  { %v2152_v9 = vpop.f32.mrf.mxu1  ;;  %v2187_v36 = vadd.f32 %v2168_v32, %v2150_v55 }
 0x20f   :  { %v2199_v2 = vmax.f32 %v2187_v36, 0.0 }
 0x212   :  { %v2053_v43 = vpop.f32.mrf.mxu2 }
 0x213   :  { %2506 = vmatmul.msk.f32.gmra.mxu3 %vm2237_vm12, %v2210_v33  ;;  %v2153_v15 = vadd.f32 %v2152_v9, %v2053_v43  ;;  %v2354_v9 = vpop.permute.xlu1 %2353 }
 0x215   :  { %v2155_v42 = vpop.f32.mrf.mxu1  ;;  %v2190_v50 = vadd.f32 %v3548_v28, %v2153_v15 }
 0x217   :  { %v2202_v39 = vmax.f32 %v2190_v50, 0.0 }
 0x21a   :  { %v2056_v45 = vpop.f32.mrf.mxu2 }
 0x21b   :  { %v2156_v31 = vadd.f32 %v2155_v42, %v2056_v45  ;;  %2507 = vmatmul.msk.f32.gmra.mxu3 %vm2237_vm12, %v2211_v14 }
 0x21d   :  { %v2158_v34 = vpop.f32.mrf.mxu1  ;;  %v2193_v24 = vadd.f32 %v2178_v59, %v2156_v31 }
 0x21f   :  { %v2205_v10 = vmax.f32 %v2193_v24, 0.0 }
 0x222   :  { %v2059_v56 = vpop.f32.mrf.mxu2 }
 0x223   :  { %v2159_v48 = vadd.f32 %v2158_v34, %v2059_v56  ;;  %2508 = vmatmul.msk.f32.gmra.mxu3 %vm2237_vm12, %v2212_v16 }
 0x225   :  { %v2196_v52 = vadd.f32 %v3546_v58, %v2159_v48  ;;  %v2235_v58 = vpop.permute.xlu0 %2234 }
 0x227   :  { %v2208_v63 = vmax.f32 %v2196_v52, 0.0 }
 0x229   :  { %2320 = vmatpush.msra.mxu0 %v2208_v63 }
 0x22b   :  { %2321 = vmatpush.msra.mxu0 %v2205_v10 }
 0x22d   :  { %2322 = vmatpush.msra.mxu0 %v2202_v39  ;;  %v2220_v20 = vpop.permute.xlu0 %2219 }
 0x22f   :  { %2323 = vmatpush.msra.mxu0 %v2199_v2 }
 0x230   :  { %2509 = vmatmul.msk.f32.vlgmr.msra.gmra.mxu0 %vm2237_vm12, %v2209_v6 }
 0x238   :  { %2510 = vmatmul.msk.f32.gmra.mxu0 %vm2237_vm12, %v2210_v33 }
 0x240   :  { %2511 = vmatmul.msk.f32.gmra.mxu0 %vm2237_vm12, %v2211_v14 }
 0x248   :  { %2512 = vmatmul.msk.f32.gmra.mxu0 %vm2237_vm12, %v2212_v16 }
 0x275   :  { %v2267_v51 = vpop.f32.mrf.mxu2 }
 0x276   :  { %v2268_v26 = vadd.f32 %v2267_v51, %v2220_v20 }
 0x278   :  { %v2337_v30 = vmax.f32 %v2268_v26, 0.0 }
 0x27d   :  { %v2270_v1 = vpop.f32.mrf.mxu2 }
 0x27e   :  { %v2271_v25 = vadd.f32 %v2270_v1, %v2225_v53 }
 0x280   :  { %v2340_v7 = vmax.f32 %v2271_v25, 0.0 }
 0x285   :  { %v2273_v0 = vpop.f32.mrf.mxu2 }
 0x286   :  { %v2274_v28 = vadd.f32 %v2273_v0, %v2230_v19 }
 0x288   :  { %v2343_v21 = vmax.f32 %v2274_v28, 0.0 }
 0x28d   :  { %v2276_v62 = vpop.f32.mrf.mxu2 }
 0x28e   :  { %v2296_v13 = vpop.f32.mrf.mxu3  ;;  %v2277_v41 = vadd.f32 %v2276_v62, %v2235_v58 }
 0x28f   :  { %v2297_v17 = vadd.f32 %v2296_v13, %v2220_v20 }
 0x290   :  { %v2346_v8 = vmax.f32 %v2277_v41, 0.0 }
 0x291   :  { %v2338_v57 = vmax.f32 %v2297_v17, 0.0 }
 0x292   :  { %2371 = vmatpush.msrb.mxu1 %v2346_v8 }
 0x294   :  { %2372 = vmatpush.msrb.mxu1 %v2343_v21 }
 0x296   :  { %v2299_v11 = vpop.f32.mrf.mxu3  ;;  %2373 = vmatpush.msrb.mxu1 %v2340_v7 }
 0x297   :  { %v2300_v18 = vadd.f32 %v2299_v11, %v2225_v53 }
 0x298   :  { %2374 = vmatpush.msrb.mxu1 %v2337_v30 }
 0x299   :  { %2513 = vmatmul.msk.f32.vlgmr.msrb.gmra.mxu1 %vm2237_vm12, %v2349_v22  ;;  %v2341_v60 = vmax.f32 %v2300_v18, 0.0 }
 0x29e   :  { %v2302_v59 = vpop.f32.mrf.mxu3 }
 0x29f   :  { %v2303_v32 = vadd.f32 %v2302_v59, %v2230_v19 }
 0x2a1   :  { %v2344_v27 = vmax.f32 %v2303_v32, 0.0 }
 0x2a6   :  { %v2305_v40 = vpop.f32.mrf.mxu3 }
 0x2a7   :  { %v2306_v54 = vadd.f32 %v2305_v40, %v2235_v58 }
 0x2a9   :  { %v2347_v5 = vmax.f32 %v2306_v54, 0.0 }
 0x2ab   :  { %2391 = vmatpush.msrb.mxu2 %v2347_v5 }
 0x2ad   :  { %v2325_v35 = vpop.f32.mrf.mxu0  ;;  %2392 = vmatpush.msrb.mxu2 %v2344_v27 }
 0x2ae   :  { %v2326_v12 = vadd.f32 %v2325_v35, %v2220_v20 }
 0x2af   :  { %2393 = vmatpush.msrb.mxu2 %v2341_v60 }
 0x2b0   :  { %v2339_v44 = vmax.f32 %v2326_v12, 0.0 }
 0x2b1   :  { %2394 = vmatpush.msrb.mxu2 %v2338_v57 }
 0x2b2   :  { %2514 = vmatmul.msk.f32.vlgmr.msrb.gmra.mxu2 %vm2237_vm12, %v2349_v22 }
 0x2b5   :  { %v2328_v4 = vpop.f32.mrf.mxu0 }
 0x2b6   :  { %v2329_v23 = vadd.f32 %v2328_v4, %v2225_v53 }
 0x2b8   :  { %v2342_v46 = vmax.f32 %v2329_v23, 0.0 }
 0x2bd   :  { %v2331_v47 = vpop.f32.mrf.mxu0 }
 0x2be   :  { %v2332_v3 = vadd.f32 %v2331_v47, %v2230_v19 }
 0x2c0   :  { %v2345_v61 = vmax.f32 %v2332_v3, 0.0 }
 0x2c5   :  { %v2334_v6 = vpop.f32.mrf.mxu0 }
 0x2c6   :  { %v2335_v38 = vadd.f32 %v2334_v6, %v2235_v58 }
 0x2c8   :  { %v2348_v29 = vmax.f32 %v2335_v38, 0.0 }
 0x2ca   :  { %2411 = vmatpush.msra.mxu3 %v2348_v29 }
 0x2cc   :  { %2412 = vmatpush.msra.mxu3 %v2345_v61 }
 0x2ce   :  { %2413 = vmatpush.msra.mxu3 %v2342_v46 }
 0x2d0   :  { %2414 = vmatpush.msra.mxu3 %v2339_v44 }
 0x2d1   :  { %2515 = vmatmul.msk.f32.vlgmr.msra.gmra.mxu3 %vm2237_vm12, %v2349_v22 }
 0x316   :  { %v2376_v37 = vpop.f32.mrf.mxu1 }
 0x317   :  { %v2377_v33 = vadd.f32 %v2376_v37, %v2354_v9 }
 0x319   :  { %v2419_v49 = vand.u32 2147483647, %v2377_v33 }
 0x31b   :  { %2422 = vst [vmem:[#allocation2] sm:$0xff] %v2419_v49 }
 0x335   :  { %v2396_v43 = vpop.f32.mrf.mxu2 }
 0x336   :  { %v2397_v14 = vadd.f32 %v2396_v43, %v2354_v9 }
 0x338   :  { %v2420_v42 = vand.u32 2147483647, %v2397_v14 }
 0x33a   :  { %2423 = vst [vmem:[#allocation2 + $0x8] sm:$0xff] %v2420_v42 }
 0x354   :  { %v2416_v45 = vpop.f32.mrf.mxu3 }
 0x355   :  { %v2417_v16 = vadd.f32 %v2416_v45, %v2354_v9 }
 0x357   :  { %v2421_v34 = vand.u32 2147483647, %v2417_v16 }
 0x359   :  { %2424 = vst [vmem:[#allocation2 + $0x10] sm:$0xff] %v2421_v34 }
 0x35a   :  { %2435 = dma.vmem_to_hbm [thread:$0]  %s2431_s30, 384, %s2433_s12, [#allocation3]  }
 0x35b   :  { %2555 = dma.done.wait [#allocation3], 384  }
 0x35c   :  { %2556 = vsyncadd [#allocation3], 4294966912 }
 0x35d   :  { %2440 = vsyncpa [#allocation3], 1 }

</bundles_post_ra>
